<compile_context>
chip_gen: v7x
topology: tpu7x:2x2x1
jax: 0.10.0
libtpu: 0.0.40
codegen_flags: <defaults>
</compile_context>

<pallas_src>
import math

import jax
import jax.numpy as jnp
from jax import lax
from jax.experimental import pallas as pl
from jax.experimental.pallas import tpu as pltpu

_LANE = 128


def _round_up(n, m):
    return ((n + m - 1) // m) * m


def _pad2d(a, rows, cols, dtype):
    out = jnp.zeros((rows, cols), dtype)
    return out.at[: a.shape[0], : a.shape[1]].set(a.astype(dtype))


def _pad_row(a, cols, dtype):
    out = jnp.zeros((1, cols), dtype)
    return out.at[0, : a.shape[0]].set(a.astype(dtype))


def _vmem_cap_bytes():
    try:
        cap = getattr(pltpu.get_tpu_info(), "vmem_capacity_bytes", None)
        if cap:
            return int(cap)
    except Exception:
        pass
    return 64 * 1024 * 1024  # conservative default (v7x per-core VMEM)


def encoder_layer(
    x,
    ln1_gamma, ln1_beta,
    wq, bq, wk, bk, wv, bv, wo, bo,
    ln2_gamma, ln2_beta,
    w1, c1, w2, c2,
    attn_bias=None,
    *,
    eps=1e-5,
    tm_max=512,
    tf_max=2048,
    weight_dtype=None,
    io_dtype=None,
    gelu_approximate=False,
):
    """Fused EncoderLayer forward (inference).

    x: (..., hidden) — the PyTorch module uses (batch, hidden), i.e. seq == 1.
    Linear weights are pre-transposed to [in_features, out_features]:
      wq/wk/wv/wo: (hidden, hidden), w1: (hidden, ffn), w2: (ffn, hidden).
    wq/bq/wk/bk and attn_bias are accepted for API parity but cannot affect
    the output: with a single key the softmax over the key axis is 1.0.
    """
    del wq, bq, wk, bk, attn_bias  # mathematical no-ops for seq_len == 1
    # TODO(synk): training-mode dropout is not implemented (identity at inference).

    orig_shape = x.shape
    H = orig_shape[-1]
    F = w1.shape[1]
    x2d = x.reshape(-1, H)
    M = x2d.shape[0]

    f32 = jnp.float32
    wdt = jnp.dtype(weight_dtype) if weight_dtype is not None else jnp.dtype(wv.dtype)
    io_dt = jnp.dtype(io_dtype) if io_dtype is not None else jnp.dtype(x.dtype)

    # ---- exact algebraic folds (done once, in f32, in the wrapper) ----------
    wv32, wo32, w132, w232 = (a.astype(f32) for a in (wv, wo, w1, w2))
    g1, be1 = ln1_gamma.astype(f32), ln1_beta.astype(f32)
    g2, be2 = ln2_gamma.astype(f32), ln2_beta.astype(f32)
    # attention block (softmax == 1) collapses to one affine map: a = norm1(x) @ Wvo + bvo
    wvo = (g1[:, None] * wv32) @ wo32
    bvo = (be1 @ wv32 + bv.astype(f32)) @ wo32 + bo.astype(f32)
    # LN2 gamma/beta folded into the first FFN matmul
    w1f = g2[:, None] * w132
    c1f = be2 @ w132 + c1.astype(f32)
    c2f = c2.astype(f32)

    # ---- lane-dense padding / tiling ----------------------------------------
    Hp = _round_up(H, _LANE)
    Fp0 = _round_up(F, _LANE)
    tf = min(Fp0, max(_LANE, (tf_max // _LANE) * _LANE))
    Fp = _round_up(Fp0, tf)

    sub = 16 if jnp.dtype(io_dt).itemsize == 2 else 8
    tm = min(tm_max, _round_up(max(1, -(-M // 2)), sub))  # >=2 row tiles when possible
    tm = max(sub, (tm // sub) * sub)
    Mp = _round_up(M, tm)
    grid_m, grid_f = Mp // tm, Fp // tf

    # Padded rows/lanes carry zeros through every stage that matters (folded
    # weight rows/cols in the padding region are zero) and are sliced off.
    x_p = _pad2d(x2d, Mp, Hp, io_dt)
    wvo_p = _pad2d(wvo, Hp, Hp, wdt)
    bvo_p = _pad_row(bvo, Hp, wdt)
    w1_p = _pad2d(w1f, Hp, Fp, wdt)
    c1_p = _pad_row(c1f, Fp, wdt)
    w2_p = _pad2d(w232, Fp, Hp, wdt)
    c2_p = _pad_row(c2f, Hp, wdt)

    inv_h = 1.0 / H
    inv_sqrt2 = 1.0 / math.sqrt(2.0)

    def kernel(x_ref, wvo_ref, bvo_ref, w1_ref, c1_ref, w2_ref, c2_ref,
               o_ref, x1_scr, y2_scr, acc_scr):
        k = pl.program_id(1)
        lane_mask = lax.broadcasted_iota(jnp.int32, (1, Hp), 1) < H

        def layer_norm(v):
            # One-pass LN (gamma/beta pre-folded into the following weights).
            vm = jnp.where(lane_mask, v, 0.0)
            mean = jnp.sum(vm, axis=-1, keepdims=True) * inv_h
            ex2 = jnp.sum(vm * vm, axis=-1, keepdims=True) * inv_h
            var = jnp.maximum(ex2 - mean * mean, 0.0)
            return (v - mean) * lax.rsqrt(var + eps)

        @pl.when(k == 0)
        def _():
            xt = x_ref[...].astype(jnp.float32)
            y = layer_norm(xt)
            a = jnp.dot(y.astype(wvo_ref.dtype), wvo_ref[...],
                        preferred_element_type=jnp.float32)
            x1 = xt + a + bvo_ref[...].astype(jnp.float32)
            x1_scr[...] = x1
            y2_scr[...] = layer_norm(x1).astype(y2_scr.dtype)
            acc_scr[...] = jnp.zeros_like(acc_scr)

        # FFN chunk: h_k = GELU(y2 @ W1[:, k]) ;  acc += h_k @ W2[k, :]
        h = jnp.dot(y2_scr[...], w1_ref[...], preferred_element_type=jnp.float32)
        h = h + c1_ref[...].astype(jnp.float32)
        if gelu_approximate:
            # tanh approximation -> EUP slot instead of the erf VPU polynomial.
            h = 0.5 * h * (1.0 + jnp.tanh(0.7978845608028654
                                          * (h + 0.044715 * h * h * h)))
        else:
            h = 0.5 * h * (1.0 + lax.erf(h * inv_sqrt2))  # exact GELU (nn.GELU)
        acc_scr[...] += jnp.dot(h.astype(w2_ref.dtype), w2_ref[...],
                                preferred_element_type=jnp.float32)

        @pl.when(k == pl.num_programs(1) - 1)
        def _():
            o_ref[...] = (x1_scr[...] + acc_scr[...]
                          + c2_ref[...].astype(jnp.float32)).astype(o_ref.dtype)

    # ---- VMEM budget (generation-aware cap) ----------------------------------
    xi, wi = jnp.dtype(io_dt).itemsize, wdt.itemsize
    est = int(
        4 * tm * Hp * xi                          # x / out tiles (double-buffered)
        + (Hp * Hp + 16 * Hp) * wi                # wvo, bvo, c2 (single-buffered)
        + 2 * (Hp * tf + tf * Hp + 8 * tf) * wi   # w1 / w2 / c1 chunks (double-buffered)
        + 3 * tm * Hp * 4                         # f32 / weight-dtype scratches
        + (tm * tf + 3 * tm * Hp) * 4             # in-kernel intermediates slack
    )
    vmem_limit = min(int(_vmem_cap_bytes() * 0.85),
                     max(32 * 1024 * 1024, est * 3 // 2))

    def _run(single_buffer_weights):
        kw = ({"pipeline_mode": pl.Buffered(buffer_count=1)}
              if single_buffer_weights else {})
        in_specs = [
            pl.BlockSpec((tm, Hp), lambda i, k: (i, 0)),           # x row tile
            pl.BlockSpec((Hp, Hp), lambda i, k: (0, 0), **kw),     # Wvo
            pl.BlockSpec((1, Hp), lambda i, k: (0, 0), **kw),      # bvo
            pl.BlockSpec((Hp, tf), lambda i, k: (0, k)),           # W1 chunk
            pl.BlockSpec((1, tf), lambda i, k: (0, k)),            # c1 chunk
            pl.BlockSpec((tf, Hp), lambda i, k: (k, 0)),           # W2 chunk
            pl.BlockSpec((1, Hp), lambda i, k: (0, 0), **kw),      # c2
        ]
        return pl.pallas_call(
            kernel,
            out_shape=jax.ShapeDtypeStruct((Mp, Hp), io_dt),
            grid_spec=pltpu.PrefetchScalarGridSpec(
                num_scalar_prefetch=0,
                grid=(grid_m, grid_f),
                in_specs=in_specs,
                out_specs=pl.BlockSpec((tm, Hp), lambda i, k: (i, 0)),
                scratch_shapes=[
                    pltpu.VMEM((tm, Hp), jnp.float32),   # x1 residual
                    pltpu.VMEM((tm, Hp), wdt),           # LN2 output (MXU LHS dtype)
                    pltpu.VMEM((tm, Hp), jnp.float32),   # FFN accumulator
                ],
            ),
            compiler_params=pltpu.CompilerParams(
                dimension_semantics=("parallel", "arbitrary"),
                vmem_limit_bytes=int(vmem_limit),
            ),
        )(x_p, wvo_p, bvo_p, w1_p, c1_p, w2_p, c2_p)

    try:
        out = _run(True)    # single-buffer the grid-invariant weights (VMEM win)
    except Exception:
        out = _run(False)   # fallback if pipeline_mode=pl.Buffered(1) unsupported

    return out[:M, :H].astype(x.dtype).reshape(orig_shape)


def _reference_encoder_layer(x, params, attn_bias, head_size, eps=1e-5):
    """Pure-JAX port of the PyTorch EncoderLayer.forward (eval mode),
    including the q/k projections, scale, attn_bias and softmax."""
    (g1, be1, wq, bq, wk, bk, wv, bv, wo, bo, g2, be2, w1, c1, w2, c2) = params

    def ln(v, g, b):
        m = v.mean(-1, keepdims=True)
        var = ((v - m) ** 2).mean(-1, keepdims=True)
        return (v - m) / jnp.sqrt(var + eps) * g + b

    B, H = x.shape
    dk = H // head_size
    scale = dk ** (-0.5)

    y = ln(x, g1, be1)
    q = (y @ wq + bq).reshape(B, 1, head_size, dk).transpose(0, 2, 1, 3)
    k = (y @ wk + bk).reshape(B, 1, head_size, dk).transpose(0, 2, 3, 1)
    v = (y @ wv + bv).reshape(B, 1, head_size, dk).transpose(0, 2, 1, 3)
    s = jnp.matmul(q * scale, k)
    if attn_bias is not None:
        s = s + attn_bias
    p = jax.nn.softmax(s, axis=3)
    o = jnp.matmul(p, v).transpose(0, 2, 1, 3).reshape(B, head_size * dk)
    a = o @ wo + bo
    x1 = x + a

    y2 = ln(x1, g2, be2)
    h = y2 @ w1 + c1
    h = 0.5 * h * (1.0 + lax.erf(h / jnp.sqrt(2.0)))  # exact GELU
    return x1 + h @ w2 + c2


if __name__ == "__main__":
    hidden_size = 32
    ffn_size = 64
    head_size = 4
    batch = 16  # the module's x is 2-D: (batch, hidden)

    key = jax.random.PRNGKey(0)
    (kx, kab, kg1, kb1, kq, kbq, kk, kbk, kv, kbv, ko, kbo,
     kg2, kb2, k1, kc1, k2, kc2) = jax.random.split(key, 18)

    x = jax.random.normal(kx, (batch, hidden_size), jnp.float32)
    attn_bias = jax.random.normal(kab, (batch, head_size, 1, 1), jnp.float32)

    limh = 1.0 / math.sqrt(hidden_size)
    limf = 1.0 / math.sqrt(ffn_size)

    def u(k, shape, lim):
        return jax.random.uniform(k, shape, jnp.float32, -lim, lim)

    ln1_gamma = 1.0 + 0.1 * jax.random.normal(kg1, (hidden_size,), jnp.float32)
    ln1_beta = 0.1 * jax.random.normal(kb1, (hidden_size,), jnp.float32)
    ln2_gamma = 1.0 + 0.1 * jax.random.normal(kg2, (hidden_size,), jnp.float32)
    ln2_beta = 0.1 * jax.random.normal(kb2, (hidden_size,), jnp.float32)

    wq = u(kq, (hidden_size, hidden_size), limh); bq = u(kbq, (hidden_size,), limh)
    wk = u(kk, (hidden_size, hidden_size), limh); bk = u(kbk, (hidden_size,), limh)
    wv = u(kv, (hidden_size, hidden_size), limh); bv = u(kbv, (hidden_size,), limh)
    wo = u(ko, (hidden_size, hidden_size), limh); bo = u(kbo, (hidden_size,), limh)
    w1 = u(k1, (hidden_size, ffn_size), limh);    c1 = u(kc1, (ffn_size,), limh)
    w2 = u(k2, (ffn_size, hidden_size), limf);    c2 = u(kc2, (hidden_size,), limf)

    y_ref = _reference_encoder_layer(
        x, (ln1_gamma, ln1_beta, wq, bq, wk, bk, wv, bv, wo, bo,
            ln2_gamma, ln2_beta, w1, c1, w2, c2), attn_bias, head_size)

    # Exact-GELU path (matches nn.GELU default).
    y = encoder_layer(
        x, ln1_gamma, ln1_beta, wq, bq, wk, bk, wv, bv, wo, bo,
        ln2_gamma, ln2_beta, w1, c1, w2, c2, attn_bias=attn_bias)
    y = jax.block_until_ready(y)
    assert y.shape == x.shape
    err = float(jnp.max(jnp.abs(y - y_ref)))
    assert jnp.allclose(y, y_ref, atol=5e-4, rtol=5e-4), err

    # Approximate (tanh / EUP-routed) GELU path — looser tolerance vs the exact
    # reference due to the approximation itself.
    y_approx = encoder_layer(
        x, ln1_gamma, ln1_beta, wq, bq, wk, bk, wv, bv, wo, bo,
        ln2_gamma, ln2_beta, w1, c1, w2, c2, attn_bias=attn_bias,
        gelu_approximate=True)
    y_approx = jax.block_until_ready(y_approx)
    err_a = float(jnp.max(jnp.abs(y_approx - y_ref)))
    assert jnp.allclose(y_approx, y_ref, atol=5e-3, rtol=5e-3), err_a

    print("KERNEL_OK")
</pallas_src>

<mosaic_0001>
module attributes {stable_mosaic.version = 11 : i64} {
  func.func @kernel(%arg0: i32, %arg1: i32, %arg2: memref<8x128xf32, #tpu.memory_space<vmem>>, %arg3: memref<128x128xf32, #tpu.memory_space<vmem>>, %arg4: memref<1x128xf32, #tpu.memory_space<vmem>>, %arg5: memref<128x128xf32, #tpu.memory_space<vmem>>, %arg6: memref<1x128xf32, #tpu.memory_space<vmem>>, %arg7: memref<128x128xf32, #tpu.memory_space<vmem>>, %arg8: memref<1x128xf32, #tpu.memory_space<vmem>>, %arg9: memref<8x128xf32, #tpu.memory_space<vmem>>, %arg10: memref<8x128xf32, #tpu.memory_space<vmem>>, %arg11: memref<8x128xf32, #tpu.memory_space<vmem>>, %arg12: memref<8x128xf32, #tpu.memory_space<vmem>>) attributes {dimension_semantics = [#tpu.dimension_semantics<parallel>, #tpu.dimension_semantics<arbitrary>], iteration_bounds = array<i64: 2, 1>, scalar_prefetch = 0 : i64, scratch_operands = 3 : i64, tpu.core_type = #tpu.core_type<tc>, window_params = [{transform_indices = @transform_0, window_bounds = array<i64: 8, 128>}, {pipeline_mode = #tpu.pipeline_mode<synchronous>, transform_indices = @transform_1, window_bounds = array<i64: 128, 128>}, {pipeline_mode = #tpu.pipeline_mode<synchronous>, transform_indices = @transform_2, window_bounds = array<i64: 1, 128>}, {transform_indices = @transform_3, window_bounds = array<i64: 128, 128>}, {transform_indices = @transform_4, window_bounds = array<i64: 1, 128>}, {transform_indices = @transform_5, window_bounds = array<i64: 128, 128>}, {pipeline_mode = #tpu.pipeline_mode<synchronous>, transform_indices = @transform_6, window_bounds = array<i64: 1, 128>}, {transform_indices = @transform_7, window_bounds = array<i64: 8, 128>}]} {
    %0 = tpu.iota {dimensions = array<i32: 1>} : vector<1x128xi32>
    %c32_i32 = arith.constant 32 : i32
    %1 = vector.broadcast %c32_i32 : i32 to vector<1x128xi32>
    %2 = arith.cmpi slt, %0, %1 : vector<1x128xi32>
    %c0_i32 = arith.constant 0 : i32
    %3 = arith.cmpi eq, %arg1, %c0_i32 : i32
    %4 = arith.extui %3 : i1 to i32
    %c0_i32_0 = arith.constant 0 : i32
    %5 = arith.cmpi ne, %4, %c0_i32_0 : i32
    scf.if %5 {
      %c0_18 = arith.constant 0 : index
      %c0_19 = arith.constant 0 : index
      %28 = vector.load %arg2[%c0_18, %c0_19] : memref<8x128xf32, #tpu.memory_space<vmem>>, vector<8x128xf32>
      %cst_20 = arith.constant 0.000000e+00 : f32
      %29 = vector.shape_cast %2 : vector<1x128xi1> to vector<1x128xi1>
      %30 = vector.broadcast %29 : vector<1x128xi1> to vector<8x128xi1>
      %31 = vector.broadcast %cst_20 : f32 to vector<8x128xf32>
      %32 = arith.select %30, %28, %31 : vector<8x128xi1>, vector<8x128xf32>
      %cst_21 = arith.constant dense<0.000000e+00> : vector<8xf32>
      %33 = vector.multi_reduction <add>, %32, %cst_21 [1] : vector<8x128xf32> to vector<8xf32>
      %34 = vector.shape_cast %33 : vector<8xf32> to vector<8x1xf32>
      %cst_22 = arith.constant 3.125000e-02 : f32
      %35 = vector.broadcast %cst_22 : f32 to vector<8x1xf32>
      %36 = arith.mulf %34, %35 : vector<8x1xf32>
      %37 = arith.mulf %32, %32 : vector<8x128xf32>
      %cst_23 = arith.constant dense<0.000000e+00> : vector<8xf32>
      %38 = vector.multi_reduction <add>, %37, %cst_23 [1] : vector<8x128xf32> to vector<8xf32>
      %39 = vector.shape_cast %38 : vector<8xf32> to vector<8x1xf32>
      %cst_24 = arith.constant 3.125000e-02 : f32
      %40 = vector.broadcast %cst_24 : f32 to vector<8x1xf32>
      %41 = arith.mulf %39, %40 : vector<8x1xf32>
      %42 = arith.mulf %36, %36 : vector<8x1xf32>
      %43 = arith.subf %41, %42 : vector<8x1xf32>
      %cst_25 = arith.constant 0.000000e+00 : f32
      %44 = vector.broadcast %cst_25 : f32 to vector<8x1xf32>
      %45 = arith.maximumf %43, %44 : vector<8x1xf32>
      %46 = vector.broadcast %36 : vector<8x1xf32> to vector<8x128xf32>
      %47 = arith.subf %28, %46 : vector<8x128xf32>
      %cst_26 = arith.constant 9.99999974E-6 : f32
      %48 = vector.broadcast %cst_26 : f32 to vector<8x1xf32>
      %49 = arith.addf %45, %48 : vector<8x1xf32>
      %50 = math.rsqrt %49 : vector<8x1xf32>
      %51 = vector.broadcast %50 : vector<8x1xf32> to vector<8x128xf32>
      %52 = arith.mulf %47, %51 : vector<8x128xf32>
      %c0_27 = arith.constant 0 : index
      %c0_28 = arith.constant 0 : index
      %53 = vector.load %arg3[%c0_27, %c0_28] : memref<128x128xf32, #tpu.memory_space<vmem>>, vector<128x128xf32>
      %cst_29 = arith.constant dense<0.000000e+00> : vector<8x128xf32>
      %54 = tpu.matmul %52, %53, %cst_29 {dimension_numbers = #tpu.dot_dimension_numbers<[1], [0], [0], [1], [0, 0, 1, 1], [], []>} : vector<8x128xf32>, vector<128x128xf32>, vector<8x128xf32> -> vector<8x128xf32>
      %55 = arith.addf %28, %54 : vector<8x128xf32>
      %c0_30 = arith.constant 0 : index
      %c0_31 = arith.constant 0 : index
      %56 = vector.load %arg4[%c0_30, %c0_31] : memref<1x128xf32, #tpu.memory_space<vmem>>, vector<1x128xf32>
      %57 = vector.broadcast %56 : vector<1x128xf32> to vector<8x128xf32>
      %58 = arith.addf %55, %57 : vector<8x128xf32>
      %c0_32 = arith.constant 0 : index
      %c0_33 = arith.constant 0 : index
      %59 = vector.load %arg10[%c0_32, %c0_33] : memref<8x128xf32, #tpu.memory_space<vmem>>, vector<8x128xf32>
      tpu.vector_store %arg10[%c0_32, %c0_33], %58 {strides = array<i32>} : memref<8x128xf32, #tpu.memory_space<vmem>>, vector<8x128xf32>,
      %cst_34 = arith.constant 0.000000e+00 : f32
      %60 = vector.shape_cast %2 : vector<1x128xi1> to vector<1x128xi1>
      %61 = vector.broadcast %60 : vector<1x128xi1> to vector<8x128xi1>
      %62 = vector.broadcast %cst_34 : f32 to vector<8x128xf32>
      %63 = arith.select %61, %58, %62 : vector<8x128xi1>, vector<8x128xf32>
      %cst_35 = arith.constant dense<0.000000e+00> : vector<8xf32>
      %64 = vector.multi_reduction <add>, %63, %cst_35 [1] : vector<8x128xf32> to vector<8xf32>
      %65 = vector.shape_cast %64 : vector<8xf32> to vector<8x1xf32>
      %cst_36 = arith.constant 3.125000e-02 : f32
      %66 = vector.broadcast %cst_36 : f32 to vector<8x1xf32>
      %67 = arith.mulf %65, %66 : vector<8x1xf32>
      %68 = arith.mulf %63, %63 : vector<8x128xf32>
      %cst_37 = arith.constant dense<0.000000e+00> : vector<8xf32>
      %69 = vector.multi_reduction <add>, %68, %cst_37 [1] : vector<8x128xf32> to vector<8xf32>
      %70 = vector.shape_cast %69 : vector<8xf32> to vector<8x1xf32>
      %cst_38 = arith.constant 3.125000e-02 : f32
      %71 = vector.broadcast %cst_38 : f32 to vector<8x1xf32>
      %72 = arith.mulf %70, %71 : vector<8x1xf32>
      %73 = arith.mulf %67, %67 : vector<8x1xf32>
      %74 = arith.subf %72, %73 : vector<8x1xf32>
      %cst_39 = arith.constant 0.000000e+00 : f32
      %75 = vector.broadcast %cst_39 : f32 to vector<8x1xf32>
      %76 = arith.maximumf %74, %75 : vector<8x1xf32>
      %77 = vector.broadcast %67 : vector<8x1xf32> to vector<8x128xf32>
      %78 = arith.subf %58, %77 : vector<8x128xf32>
      %cst_40 = arith.constant 9.99999974E-6 : f32
      %79 = vector.broadcast %cst_40 : f32 to vector<8x1xf32>
      %80 = arith.addf %76, %79 : vector<8x1xf32>
      %81 = math.rsqrt %80 : vector<8x1xf32>
      %82 = vector.broadcast %81 : vector<8x1xf32> to vector<8x128xf32>
      %83 = arith.mulf %78, %82 : vector<8x128xf32>
      %c0_41 = arith.constant 0 : index
      %c0_42 = arith.constant 0 : index
      %84 = vector.load %arg11[%c0_41, %c0_42] : memref<8x128xf32, #tpu.memory_space<vmem>>, vector<8x128xf32>
      tpu.vector_store %arg11[%c0_41, %c0_42], %83 {strides = array<i32>} : memref<8x128xf32, #tpu.memory_space<vmem>>, vector<8x128xf32>,
      %cst_43 = arith.constant 0.000000e+00 : f32
      %85 = vector.broadcast %cst_43 : f32 to vector<8x128xf32>
      %c0_44 = arith.constant 0 : index
      %c0_45 = arith.constant 0 : index
      %86 = vector.load %arg12[%c0_44, %c0_45] : memref<8x128xf32, #tpu.memory_space<vmem>>, vector<8x128xf32>
      tpu.vector_store %arg12[%c0_44, %c0_45], %85 {strides = array<i32>} : memref<8x128xf32, #tpu.memory_space<vmem>>, vector<8x128xf32>,
    } else {
    }
    %c0 = arith.constant 0 : index
    %c0_1 = arith.constant 0 : index
    %6 = vector.load %arg11[%c0, %c0_1] : memref<8x128xf32, #tpu.memory_space<vmem>>, vector<8x128xf32>
    %c0_2 = arith.constant 0 : index
    %c0_3 = arith.constant 0 : index
    %7 = vector.load %arg5[%c0_2, %c0_3] : memref<128x128xf32, #tpu.memory_space<vmem>>, vector<128x128xf32>
    %cst = arith.constant dense<0.000000e+00> : vector<8x128xf32>
    %8 = tpu.matmul %6, %7, %cst {dimension_numbers = #tpu.dot_dimension_numbers<[1], [0], [0], [1], [0, 0, 1, 1], [], []>} : vector<8x128xf32>, vector<128x128xf32>, vector<8x128xf32> -> vector<8x128xf32>
    %c0_4 = arith.constant 0 : index
    %c0_5 = arith.constant 0 : index
    %9 = vector.load %arg6[%c0_4, %c0_5] : memref<1x128xf32, #tpu.memory_space<vmem>>, vector<1x128xf32>
    %10 = vector.broadcast %9 : vector<1x128xf32> to vector<8x128xf32>
    %11 = arith.addf %8, %10 : vector<8x128xf32>
    %cst_6 = arith.constant 5.000000e-01 : f32
    %12 = vector.broadcast %cst_6 : f32 to vector<8x128xf32>
    %13 = arith.mulf %12, %11 : vector<8x128xf32>
    %cst_7 = arith.constant 0.707106769 : f32
    %14 = vector.broadcast %cst_7 : f32 to vector<8x128xf32>
    %15 = arith.mulf %11, %14 : vector<8x128xf32>
    %16 = math.erf %15 : vector<8x128xf32>
    %cst_8 = arith.constant 1.000000e+00 : f32
    %17 = vector.broadcast %cst_8 : f32 to vector<8x128xf32>
    %18 = arith.addf %17, %16 : vector<8x128xf32>
    %19 = arith.mulf %13, %18 : vector<8x128xf32>
    %c0_9 = arith.constant 0 : index
    %c0_10 = arith.constant 0 : index
    %20 = vector.load %arg12[%c0_9, %c0_10] : memref<8x128xf32, #tpu.memory_space<vmem>>, vector<8x128xf32>
    %c0_11 = arith.constant 0 : index
    %c0_12 = arith.constant 0 : index
    %21 = vector.load %arg7[%c0_11, %c0_12] : memref<128x128xf32, #tpu.memory_space<vmem>>, vector<128x128xf32>
    %cst_13 = arith.constant dense<0.000000e+00> : vector<8x128xf32>
    %22 = tpu.matmul %19, %21, %cst_13 {dimension_numbers = #tpu.dot_dimension_numbers<[1], [0], [0], [1], [0, 0, 1, 1], [], []>} : vector<8x128xf32>, vector<128x128xf32>, vector<8x128xf32> -> vector<8x128xf32>
    %23 = arith.addf %20, %22 : vector<8x128xf32>
    %c0_14 = arith.constant 0 : index
    %c0_15 = arith.constant 0 : index
    %24 = vector.load %arg12[%c0_14, %c0_15] : memref<8x128xf32, #tpu.memory_space<vmem>>, vector<8x128xf32>
    tpu.vector_store %arg12[%c0_14, %c0_15], %23 {strides = array<i32>} : memref<8x128xf32, #tpu.memory_space<vmem>>, vector<8x128xf32>,
    %c0_i32_16 = arith.constant 0 : i32
    %25 = arith.cmpi eq, %arg1, %c0_i32_16 : i32
    %26 = arith.extui %25 : i1 to i32
    %c0_i32_17 = arith.constant 0 : i32
    %27 = arith.cmpi ne, %26, %c0_i32_17 : i32
    scf.if %27 {
      %c0_18 = arith.constant 0 : index
      %c0_19 = arith.constant 0 : index
      %28 = vector.load %arg10[%c0_18, %c0_19] : memref<8x128xf32, #tpu.memory_space<vmem>>, vector<8x128xf32>
      %c0_20 = arith.constant 0 : index
      %c0_21 = arith.constant 0 : index
      %29 = vector.load %arg12[%c0_20, %c0_21] : memref<8x128xf32, #tpu.memory_space<vmem>>, vector<8x128xf32>
      %30 = arith.addf %28, %29 : vector<8x128xf32>
      %c0_22 = arith.constant 0 : index
      %c0_23 = arith.constant 0 : index
      %31 = vector.load %arg8[%c0_22, %c0_23] : memref<1x128xf32, #tpu.memory_space<vmem>>, vector<1x128xf32>
      %32 = vector.broadcast %31 : vector<1x128xf32> to vector<8x128xf32>
      %33 = arith.addf %30, %32 : vector<8x128xf32>
      %c0_24 = arith.constant 0 : index
      %c0_25 = arith.constant 0 : index
      %34 = vector.load %arg9[%c0_24, %c0_25] : memref<8x128xf32, #tpu.memory_space<vmem>>, vector<8x128xf32>
      tpu.vector_store %arg9[%c0_24, %c0_25], %33 {strides = array<i32>} : memref<8x128xf32, #tpu.memory_space<vmem>>, vector<8x128xf32>,
    } else {
    }
    return
  }
  func.func @transform_0(%arg0: i32, %arg1: i32) -> (i32, i32) {
    %c0_i32 = arith.constant 0 : i32
    %c0_i32_0 = arith.constant 0 : i32
    return %arg0, %c0_i32 : i32, i32
  }
  func.func @transform_1(%arg0: i32, %arg1: i32) -> (i32, i32) {
    %c0_i32 = arith.constant 0 : i32
    %c0_i32_0 = arith.constant 0 : i32
    %c0_i32_1 = arith.constant 0 : i32
    return %c0_i32, %c0_i32_0 : i32, i32
  }
  func.func @transform_2(%arg0: i32, %arg1: i32) -> (i32, i32) {
    %c0_i32 = arith.constant 0 : i32
    %c0_i32_0 = arith.constant 0 : i32
    %c0_i32_1 = arith.constant 0 : i32
    return %c0_i32, %c0_i32_0 : i32, i32
  }
  func.func @transform_3(%arg0: i32, %arg1: i32) -> (i32, i32) {
    %c0_i32 = arith.constant 0 : i32
    %c0_i32_0 = arith.constant 0 : i32
    return %c0_i32, %arg1 : i32, i32
  }
  func.func @transform_4(%arg0: i32, %arg1: i32) -> (i32, i32) {
    %c0_i32 = arith.constant 0 : i32
    %c0_i32_0 = arith.constant 0 : i32
    return %c0_i32, %arg1 : i32, i32
  }
  func.func @transform_5(%arg0: i32, %arg1: i32) -> (i32, i32) {
    %c0_i32 = arith.constant 0 : i32
    %c0_i32_0 = arith.constant 0 : i32
    return %arg1, %c0_i32 : i32, i32
  }
  func.func @transform_6(%arg0: i32, %arg1: i32) -> (i32, i32) {
    %c0_i32 = arith.constant 0 : i32
    %c0_i32_0 = arith.constant 0 : i32
    %c0_i32_1 = arith.constant 0 : i32
    return %c0_i32, %c0_i32_0 : i32, i32
  }
  func.func @transform_7(%arg0: i32, %arg1: i32) -> (i32, i32) {
    %c0_i32 = arith.constant 0 : i32
    %c0_i32_0 = arith.constant 0 : i32
    return %arg0, %c0_i32 : i32, i32
  }
}

module attributes {stable_mosaic.version = 11 : i64} {
  func.func @kernel(%arg0: i32, %arg1: i32, %arg2: memref<8x128xf32, #tpu.memory_space<vmem>>, %arg3: memref<128x128xf32, #tpu.memory_space<vmem>>, %arg4: memref<1x128xf32, #tpu.memory_space<vmem>>, %arg5: memref<128x128xf32, #tpu.memory_space<vmem>>, %arg6: memref<1x128xf32, #tpu.memory_space<vmem>>, %arg7: memref<128x128xf32, #tpu.memory_space<vmem>>, %arg8: memref<1x128xf32, #tpu.memory_space<vmem>>, %arg9: memref<8x128xf32, #tpu.memory_space<vmem>>, %arg10: memref<8x128xf32, #tpu.memory_space<vmem>>, %arg11: memref<8x128xf32, #tpu.memory_space<vmem>>, %arg12: memref<8x128xf32, #tpu.memory_space<vmem>>) attributes {dimension_semantics = [#tpu.dimension_semantics<parallel>, #tpu.dimension_semantics<arbitrary>], iteration_bounds = array<i64: 2, 1>, scalar_prefetch = 0 : i64, scratch_operands = 3 : i64, tpu.core_type = #tpu.core_type<tc>, window_params = [{transform_indices = @transform_0, window_bounds = array<i64: 8, 128>}, {pipeline_mode = #tpu.pipeline_mode<synchronous>, transform_indices = @transform_1, window_bounds = array<i64: 128, 128>}, {pipeline_mode = #tpu.pipeline_mode<synchronous>, transform_indices = @transform_2, window_bounds = array<i64: 1, 128>}, {transform_indices = @transform_3, window_bounds = array<i64: 128, 128>}, {transform_indices = @transform_4, window_bounds = array<i64: 1, 128>}, {transform_indices = @transform_5, window_bounds = array<i64: 128, 128>}, {pipeline_mode = #tpu.pipeline_mode<synchronous>, transform_indices = @transform_6, window_bounds = array<i64: 1, 128>}, {transform_indices = @transform_7, window_bounds = array<i64: 8, 128>}]} {
    %0 = tpu.iota {dimensions = array<i32: 1>} : vector<1x128xi32>
    %c32_i32 = arith.constant 32 : i32
    %1 = vector.broadcast %c32_i32 : i32 to vector<1x128xi32>
    %2 = arith.cmpi slt, %0, %1 : vector<1x128xi32>
    %c0_i32 = arith.constant 0 : i32
    %3 = arith.cmpi eq, %arg1, %c0_i32 : i32
    %4 = arith.extui %3 : i1 to i32
    %c0_i32_0 = arith.constant 0 : i32
    %5 = arith.cmpi ne, %4, %c0_i32_0 : i32
    scf.if %5 {
      %c0_18 = arith.constant 0 : index
      %c0_19 = arith.constant 0 : index
      %28 = vector.load %arg2[%c0_18, %c0_19] : memref<8x128xf32, #tpu.memory_space<vmem>>, vector<8x128xf32>
      %cst_20 = arith.constant 0.000000e+00 : f32
      %29 = vector.shape_cast %2 : vector<1x128xi1> to vector<1x128xi1>
      %30 = vector.broadcast %29 : vector<1x128xi1> to vector<8x128xi1>
      %31 = vector.broadcast %cst_20 : f32 to vector<8x128xf32>
      %32 = arith.select %30, %28, %31 : vector<8x128xi1>, vector<8x128xf32>
      %cst_21 = arith.constant dense<0.000000e+00> : vector<8xf32>
      %33 = vector.multi_reduction <add>, %32, %cst_21 [1] : vector<8x128xf32> to vector<8xf32>
      %34 = vector.shape_cast %33 : vector<8xf32> to vector<8x1xf32>
      %cst_22 = arith.constant 3.125000e-02 : f32
      %35 = vector.broadcast %cst_22 : f32 to vector<8x1xf32>
      %36 = arith.mulf %34, %35 : vector<8x1xf32>
      %37 = arith.mulf %32, %32 : vector<8x128xf32>
      %cst_23 = arith.constant dense<0.000000e+00> : vector<8xf32>
      %38 = vector.multi_reduction <add>, %37, %cst_23 [1] : vector<8x128xf32> to vector<8xf32>
      %39 = vector.shape_cast %38 : vector<8xf32> to vector<8x1xf32>
      %cst_24 = arith.constant 3.125000e-02 : f32
      %40 = vector.broadcast %cst_24 : f32 to vector<8x1xf32>
      %41 = arith.mulf %39, %40 : vector<8x1xf32>
      %42 = arith.mulf %36, %36 : vector<8x1xf32>
      %43 = arith.subf %41, %42 : vector<8x1xf32>
      %cst_25 = arith.constant 0.000000e+00 : f32
      %44 = vector.broadcast %cst_25 : f32 to vector<8x1xf32>
      %45 = arith.maximumf %43, %44 : vector<8x1xf32>
      %46 = vector.broadcast %36 : vector<8x1xf32> to vector<8x128xf32>
      %47 = arith.subf %28, %46 : vector<8x128xf32>
      %cst_26 = arith.constant 9.99999974E-6 : f32
      %48 = vector.broadcast %cst_26 : f32 to vector<8x1xf32>
      %49 = arith.addf %45, %48 : vector<8x1xf32>
      %50 = math.rsqrt %49 : vector<8x1xf32>
      %51 = vector.broadcast %50 : vector<8x1xf32> to vector<8x128xf32>
      %52 = arith.mulf %47, %51 : vector<8x128xf32>
      %c0_27 = arith.constant 0 : index
      %c0_28 = arith.constant 0 : index
      %53 = vector.load %arg3[%c0_27, %c0_28] : memref<128x128xf32, #tpu.memory_space<vmem>>, vector<128x128xf32>
      %cst_29 = arith.constant dense<0.000000e+00> : vector<8x128xf32>
      %54 = tpu.matmul %52, %53, %cst_29 {dimension_numbers = #tpu.dot_dimension_numbers<[1], [0], [0], [1], [0, 0, 1, 1], [], []>} : vector<8x128xf32>, vector<128x128xf32>, vector<8x128xf32> -> vector<8x128xf32>
      %55 = arith.addf %28, %54 : vector<8x128xf32>
      %c0_30 = arith.constant 0 : index
      %c0_31 = arith.constant 0 : index
      %56 = vector.load %arg4[%c0_30, %c0_31] : memref<1x128xf32, #tpu.memory_space<vmem>>, vector<1x128xf32>
      %57 = vector.broadcast %56 : vector<1x128xf32> to vector<8x128xf32>
      %58 = arith.addf %55, %57 : vector<8x128xf32>
      %c0_32 = arith.constant 0 : index
      %c0_33 = arith.constant 0 : index
      %59 = vector.load %arg10[%c0_32, %c0_33] : memref<8x128xf32, #tpu.memory_space<vmem>>, vector<8x128xf32>
      tpu.vector_store %arg10[%c0_32, %c0_33], %58 {strides = array<i32>} : memref<8x128xf32, #tpu.memory_space<vmem>>, vector<8x128xf32>,
      %cst_34 = arith.constant 0.000000e+00 : f32
      %60 = vector.shape_cast %2 : vector<1x128xi1> to vector<1x128xi1>
      %61 = vector.broadcast %60 : vector<1x128xi1> to vector<8x128xi1>
      %62 = vector.broadcast %cst_34 : f32 to vector<8x128xf32>
      %63 = arith.select %61, %58, %62 : vector<8x128xi1>, vector<8x128xf32>
      %cst_35 = arith.constant dense<0.000000e+00> : vector<8xf32>
      %64 = vector.multi_reduction <add>, %63, %cst_35 [1] : vector<8x128xf32> to vector<8xf32>
      %65 = vector.shape_cast %64 : vector<8xf32> to vector<8x1xf32>
      %cst_36 = arith.constant 3.125000e-02 : f32
      %66 = vector.broadcast %cst_36 : f32 to vector<8x1xf32>
      %67 = arith.mulf %65, %66 : vector<8x1xf32>
      %68 = arith.mulf %63, %63 : vector<8x128xf32>
      %cst_37 = arith.constant dense<0.000000e+00> : vector<8xf32>
      %69 = vector.multi_reduction <add>, %68, %cst_37 [1] : vector<8x128xf32> to vector<8xf32>
      %70 = vector.shape_cast %69 : vector<8xf32> to vector<8x1xf32>
      %cst_38 = arith.constant 3.125000e-02 : f32
      %71 = vector.broadcast %cst_38 : f32 to vector<8x1xf32>
      %72 = arith.mulf %70, %71 : vector<8x1xf32>
      %73 = arith.mulf %67, %67 : vector<8x1xf32>
      %74 = arith.subf %72, %73 : vector<8x1xf32>
      %cst_39 = arith.constant 0.000000e+00 : f32
      %75 = vector.broadcast %cst_39 : f32 to vector<8x1xf32>
      %76 = arith.maximumf %74, %75 : vector<8x1xf32>
      %77 = vector.broadcast %67 : vector<8x1xf32> to vector<8x128xf32>
      %78 = arith.subf %58, %77 : vector<8x128xf32>
      %cst_40 = arith.constant 9.99999974E-6 : f32
      %79 = vector.broadcast %cst_40 : f32 to vector<8x1xf32>
      %80 = arith.addf %76, %79 : vector<8x1xf32>
      %81 = math.rsqrt %80 : vector<8x1xf32>
      %82 = vector.broadcast %81 : vector<8x1xf32> to vector<8x128xf32>
      %83 = arith.mulf %78, %82 : vector<8x128xf32>
      %c0_41 = arith.constant 0 : index
      %c0_42 = arith.constant 0 : index
      %84 = vector.load %arg11[%c0_41, %c0_42] : memref<8x128xf32, #tpu.memory_space<vmem>>, vector<8x128xf32>
      tpu.vector_store %arg11[%c0_41, %c0_42], %83 {strides = array<i32>} : memref<8x128xf32, #tpu.memory_space<vmem>>, vector<8x128xf32>,
      %cst_43 = arith.constant 0.000000e+00 : f32
      %85 = vector.broadcast %cst_43 : f32 to vector<8x128xf32>
      %c0_44 = arith.constant 0 : index
      %c0_45 = arith.constant 0 : index
      %86 = vector.load %arg12[%c0_44, %c0_45] : memref<8x128xf32, #tpu.memory_space<vmem>>, vector<8x128xf32>
      tpu.vector_store %arg12[%c0_44, %c0_45], %85 {strides = array<i32>} : memref<8x128xf32, #tpu.memory_space<vmem>>, vector<8x128xf32>,
    } else {
    }
    %c0 = arith.constant 0 : index
    %c0_1 = arith.constant 0 : index
    %6 = vector.load %arg11[%c0, %c0_1] : memref<8x128xf32, #tpu.memory_space<vmem>>, vector<8x128xf32>
    %c0_2 = arith.constant 0 : index
    %c0_3 = arith.constant 0 : index
    %7 = vector.load %arg5[%c0_2, %c0_3] : memref<128x128xf32, #tpu.memory_space<vmem>>, vector<128x128xf32>
    %cst = arith.constant dense<0.000000e+00> : vector<8x128xf32>
    %8 = tpu.matmul %6, %7, %cst {dimension_numbers = #tpu.dot_dimension_numbers<[1], [0], [0], [1], [0, 0, 1, 1], [], []>} : vector<8x128xf32>, vector<128x128xf32>, vector<8x128xf32> -> vector<8x128xf32>
    %c0_4 = arith.constant 0 : index
    %c0_5 = arith.constant 0 : index
    %9 = vector.load %arg6[%c0_4, %c0_5] : memref<1x128xf32, #tpu.memory_space<vmem>>, vector<1x128xf32>
    %10 = vector.broadcast %9 : vector<1x128xf32> to vector<8x128xf32>
    %11 = arith.addf %8, %10 : vector<8x128xf32>
    %cst_6 = arith.constant 5.000000e-01 : f32
    %12 = vector.broadcast %cst_6 : f32 to vector<8x128xf32>
    %13 = arith.mulf %12, %11 : vector<8x128xf32>
    %cst_7 = arith.constant 0.707106769 : f32
    %14 = vector.broadcast %cst_7 : f32 to vector<8x128xf32>
    %15 = arith.mulf %11, %14 : vector<8x128xf32>
    %16 = math.erf %15 : vector<8x128xf32>
    %cst_8 = arith.constant 1.000000e+00 : f32
    %17 = vector.broadcast %cst_8 : f32 to vector<8x128xf32>
    %18 = arith.addf %17, %16 : vector<8x128xf32>
    %19 = arith.mulf %13, %18 : vector<8x128xf32>
    %c0_9 = arith.constant 0 : index
    %c0_10 = arith.constant 0 : index
    %20 = vector.load %arg12[%c0_9, %c0_10] : memref<8x128xf32, #tpu.memory_space<vmem>>, vector<8x128xf32>
    %c0_11 = arith.constant 0 : index
    %c0_12 = arith.constant 0 : index
    %21 = vector.load %arg7[%c0_11, %c0_12] : memref<128x128xf32, #tpu.memory_space<vmem>>, vector<128x128xf32>
    %cst_13 = arith.constant dense<0.000000e+00> : vector<8x128xf32>
    %22 = tpu.matmul %19, %21, %cst_13 {dimension_numbers = #tpu.dot_dimension_numbers<[1], [0], [0], [1], [0, 0, 1, 1], [], []>} : vector<8x128xf32>, vector<128x128xf32>, vector<8x128xf32> -> vector<8x128xf32>
    %23 = arith.addf %20, %22 : vector<8x128xf32>
    %c0_14 = arith.constant 0 : index
    %c0_15 = arith.constant 0 : index
    %24 = vector.load %arg12[%c0_14, %c0_15] : memref<8x128xf32, #tpu.memory_space<vmem>>, vector<8x128xf32>
    tpu.vector_store %arg12[%c0_14, %c0_15], %23 {strides = array<i32>} : memref<8x128xf32, #tpu.memory_space<vmem>>, vector<8x128xf32>,
    %c0_i32_16 = arith.constant 0 : i32
    %25 = arith.cmpi eq, %arg1, %c0_i32_16 : i32
    %26 = arith.extui %25 : i1 to i32
    %c0_i32_17 = arith.constant 0 : i32
    %27 = arith.cmpi ne, %26, %c0_i32_17 : i32
    scf.if %27 {
      %c0_18 = arith.constant 0 : index
      %c0_19 = arith.constant 0 : index
      %28 = vector.load %arg10[%c0_18, %c0_19] : memref<8x128xf32, #tpu.memory_space<vmem>>, vector<8x128xf32>
      %c0_20 = arith.constant 0 : index
      %c0_21 = arith.constant 0 : index
      %29 = vector.load %arg12[%c0_20, %c0_21] : memref<8x128xf32, #tpu.memory_space<vmem>>, vector<8x128xf32>
      %30 = arith.addf %28, %29 : vector<8x128xf32>
      %c0_22 = arith.constant 0 : index
      %c0_23 = arith.constant 0 : index
      %31 = vector.load %arg8[%c0_22, %c0_23] : memref<1x128xf32, #tpu.memory_space<vmem>>, vector<1x128xf32>
      %32 = vector.broadcast %31 : vector<1x128xf32> to vector<8x128xf32>
      %33 = arith.addf %30, %32 : vector<8x128xf32>
      %c0_24 = arith.constant 0 : index
      %c0_25 = arith.constant 0 : index
      %34 = vector.load %arg9[%c0_24, %c0_25] : memref<8x128xf32, #tpu.memory_space<vmem>>, vector<8x128xf32>
      tpu.vector_store %arg9[%c0_24, %c0_25], %33 {strides = array<i32>} : memref<8x128xf32, #tpu.memory_space<vmem>>, vector<8x128xf32>,
    } else {
    }
    return
  }
  func.func @transform_0(%arg0: i32, %arg1: i32) -> (i32, i32) {
    %c0_i32 = arith.constant 0 : i32
    %c0_i32_0 = arith.constant 0 : i32
    return %arg0, %c0_i32 : i32, i32
  }
  func.func @transform_1(%arg0: i32, %arg1: i32) -> (i32, i32) {
    %c0_i32 = arith.constant 0 : i32
    %c0_i32_0 = arith.constant 0 : i32
    %c0_i32_1 = arith.constant 0 : i32
    return %c0_i32, %c0_i32_0 : i32, i32
  }
  func.func @transform_2(%arg0: i32, %arg1: i32) -> (i32, i32) {
    %c0_i32 = arith.constant 0 : i32
    %c0_i32_0 = arith.constant 0 : i32
    %c0_i32_1 = arith.constant 0 : i32
    return %c0_i32, %c0_i32_0 : i32, i32
  }
  func.func @transform_3(%arg0: i32, %arg1: i32) -> (i32, i32) {
    %c0_i32 = arith.constant 0 : i32
    %c0_i32_0 = arith.constant 0 : i32
    return %c0_i32, %arg1 : i32, i32
  }
  func.func @transform_4(%arg0: i32, %arg1: i32) -> (i32, i32) {
    %c0_i32 = arith.constant 0 : i32
    %c0_i32_0 = arith.constant 0 : i32
    return %c0_i32, %arg1 : i32, i32
  }
  func.func @transform_5(%arg0: i32, %arg1: i32) -> (i32, i32) {
    %c0_i32 = arith.constant 0 : i32
    %c0_i32_0 = arith.constant 0 : i32
    return %arg1, %c0_i32 : i32, i32
  }
  func.func @transform_6(%arg0: i32, %arg1: i32) -> (i32, i32) {
    %c0_i32 = arith.constant 0 : i32
    %c0_i32_0 = arith.constant 0 : i32
    %c0_i32_1 = arith.constant 0 : i32
    return %c0_i32, %c0_i32_0 : i32, i32
  }
  func.func @transform_7(%arg0: i32, %arg1: i32) -> (i32, i32) {
    %c0_i32 = arith.constant 0 : i32
    %c0_i32_0 = arith.constant 0 : i32
    return %arg0, %c0_i32 : i32, i32
  }
}

</mosaic_0001>

<bundles_post_ra>
// kernel: tpu_custom_call.1
= control target key start
LH: loop header
LB: loop body
LE: loop exit
PB: predicated region body
PF: predicated region fallthrough
CT: control target
= control target key end

     0   :  { %s1810_s0 = inlined_call_operand.hbm [shape: f32[16,128], index: 0, kind: input, shape index: {}]   ;;  %s1811_s1 = inlined_call_operand.hbm [shape: f32[128,128], index: 1, kind: input, shape index: {}]   ;;  %s1812_s2 = inlined_call_operand.vmem [shape: f32[1,128], index: 2, kind: input, shape index: {}]   ;;  %s1813_s3 = inlined_call_operand.hbm [shape: f32[128,128], index: 3, kind: input, shape index: {}]   ;;  %s1814_s4 = inlined_call_operand.vmem [shape: f32[1,128], index: 4, kind: input, shape index: {}]   ;;  %s1815_s5 = inlined_call_operand.hbm [shape: f32[128,128], index: 5, kind: input, shape index: {}]   ;;  %s1816_s6 = inlined_call_operand.vmem [shape: f32[1,128], index: 6, kind: input, shape index: {}]   ;;  %s1817_s7 = inlined_call_operand.hbm [shape: f32[16,128], index: 7, kind: output, shape index: {}]  }
   0x1   :  { %1825 = sst [smem:[#allocation20_spill]] %s1816_s6 }
   0x2   :  { %1826 = sst [smem:[#allocation21_spill]] %s1817_s7 }
   0x3   :  { %12 = vsyncpa [#allocation6], 0 }
   0x4   :  { %14 = vsyncpa [#allocation6 + $0x1], 0 }
   0x5   :  { %15 = vsyncpa [#allocation9], 0 }
   0x6   :  { %16 = vsyncpa [#allocation12], 0 }
   0x7   :  { %17 = vsyncpa [#allocation7], 0 }
   0x8   :  { %19 = vsyncpa [#allocation7 + $0x1], 0  ;;  %s1469_s24 = smov 0   ;;  %s1471_s25 = smov 0  }
   0x9   :  { %s1473_s26 = smov 0   ;;  %s1475_s27 = smov 0  }
   0xa   :  { %s1477_s28 = smov 0   ;;  %s1479_s29 = smov 0  }
   0xb LB: > { %1827 = sst [smem:[#allocation18_spill]] %s1397_s24  ;;  %s858_s30 = sadd.s32 4294967295, %s1417_s29   ;;  %s1417_s29 = sphi %s1479_s29, %s25_s29   ;;  %s1413_s28 = sphi %s1477_s28, %s1852_s28   ;;  %s1409_s27 = sphi %s1475_s27, %s1851_s27   ;;  %s1405_s26 = sphi %s1473_s26, %s1850_s26   ;;  %s1401_s25 = sphi %s1471_s25, %s1849_s25   ;;  %s1397_s24 = sphi %s1469_s24, %s1848_s24  }
   0xc   : > { %s859_s8 = sadd.s32 4294967294, %s1417_s29   ;;  %p57_p0 = scmp.ne.s32.totalorder %s1401_s25, %s1397_s24 }
   0xd   : > { %p1503_p1 = scmp.eq.s32.totalorder %s858_s30, 0  ;;  %p1507_p2 = scmp.eq.s32.totalorder %s858_s30, 1 }
   0xe   : > { %p228_p3 = scmp.eq.s32.totalorder %s859_s8, 1  ;;  %p860_p5 = scmp.ge.s32.totalorder %s1417_s29, 1 }
   0xf   : > { %s1828_s9 = scalar_select %p1503_p1, 1, 0 }
  0x10   : > { %s1829_s10 = scalar_select %p1507_p2, 1, 0 }
  0x11   : > { %p1513_p4 = por %p1503_p1, %p57_p0  ;;  %p1518_p6 = por %p228_p3, %p57_p0 }
  0x12   : > { %p235_p7 = scmp.lt.s32.totalorder %s1417_s29, 3  ;;  %s1419_s14 = smov [#allocation8]  }
  0x13   : > { %s1830_s11 = scalar_select %p1513_p4, 1, 0 }
  0x14   : > { %s1831_s12 = scalar_select %p1518_p6, 1, 0 }
  0x15   : > { %p1523_p8 = pnand %p860_p5, %p235_p7  ;;  %s247_s15 = sshll.u32 %s1419_s14, 4  ;;  %s1527_s15 = int_to_ptr.vmem [resolvable:$true] %s247_s15 }
  0x16   : > { %1832 = sst [smem:[#allocation19_spill]] %s1831_s12  ;;  %s1420_s17 = smov [#allocation10]  }
  0x17   : > { %s1833_s13 = scalar_select %p1523_p8, 1, 0 }
  0x18   : > { %p1125_p9 = pneg %p1523_p8  ;;  %s265_s18 = sshll.u32 %s1420_s17, 4  ;;  %s1538_s18 = int_to_ptr.vmem [resolvable:$true] %s265_s18 }
  0x19   : > { %s1421_s19 = smov [#allocation11]   ;;  %s1213_s23 = scalar_lea.hbm %s1811_s1, 2048 }
  0x1a   : > { %p1534_p11 = pnand %p1125_p9, %p1503_p1  ;;  %s1540_s20 = sshll.u32 %s1421_s19, 4  ;;  %s288_s20 = int_to_ptr.vmem [resolvable:$true] %s1540_s20 }
  0x1b   : > { %p1214_p12 = scmp.ne.s32.totalorder %s1811_s1, %s1213_s23  ;;  %p1220_p5 = scmp.lt.u32.totalorder %s1213_s23, %s1811_s1 }
  0x1c   : > { %p1550_p13 = pneg %p1534_p11 }
  0x1e   : > { %p1216_p0 = pnand %p1550_p13, %p1214_p12 }
  0x20   : > { %p1217_p3 = pneg %p1216_p0 }
  0x22   : > { %p1222_p7 = pnand %p1220_p5, %p1217_p3 }
  0x24   : > { %1225 = shalt.err (!%p1222_p7)
}
  0x25   : > { %s1226_s21 = scalar_lea.vmem %s1527_s15, 2048  ;;  %p1234_p1 = scmp.lt.s32.totalorder %s1527_s15, %s1527_s15 }
  0x26   : > { %p1227_p9 = scmp.ne.s32.totalorder %s1527_s15, %s1226_s21  ;;  %p1235_p4 = scmp.lt.s32.totalorder %s1226_s21, %s1226_s21 }
  0x28   : > { %p1229_p10 = pnand %p1227_p9, %p1550_p13  ;;  %p1236_p12 = por %p1235_p4, %p1234_p1 }
  0x2a   : > { %p1230_p6 = pneg %p1229_p10 }
  0x2c   : > { %p1237_p0 = pnand %p1236_p12, %p1230_p6 }
  0x2e   : > { %1240 = shalt.err (!%p1237_p0)
}
  0x2f   : > { %s1422_s22 = smov 128   ;;  %s1423_s23 = smov 8  }
  0x30   : > { %1128 = dma.hbm_to_vmem [thread:$0]  (!%p1534_p11), %s1811_s1, 2048, %s1527_s15, [#allocation9], %s1422_s22, %s1422_s22, %s1423_s23  }
  0x31   : > { %s1241_s21 = scalar_lea.hbm %s1813_s3, 2048 }
  0x32   : > { %p1242_p1 = scmp.ne.s32.totalorder %s1813_s3, %s1241_s21  ;;  %p1248_p10 = scmp.lt.u32.totalorder %s1241_s21, %s1813_s3 }
  0x34   : > { %p1244_p4 = pnand %p1242_p1, %p1550_p13 }
  0x36   : > { %p1245_p6 = pneg %p1244_p4 }
  0x38   : > { %p1250_p3 = pnand %p1248_p10, %p1245_p6 }
  0x3a   : > { %1253 = shalt.err (!%p1250_p3)
}
  0x3b   : > { %s1254_s15 = scalar_lea.vmem %s1538_s18, 2048  ;;  %p1262_p12 = scmp.lt.s32.totalorder %s1538_s18, %s1538_s18 }
  0x3c   : > { %p1255_p5 = scmp.ne.s32.totalorder %s1538_s18, %s1254_s15  ;;  %p1263_p0 = scmp.lt.s32.totalorder %s1254_s15, %s1254_s15 }
  0x3e   : > { %p1257_p7 = pnand %p1255_p5, %p1550_p13  ;;  %p1264_p1 = por %p1263_p0, %p1262_p12 }
  0x40   : > { %p1258_p9 = pneg %p1257_p7 }
  0x42   : > { %p1265_p4 = pnand %p1264_p1, %p1258_p9 }
  0x44   : > { %1268 = shalt.err (!%p1265_p4)
}
  0x45   : > { %1131 = dma.hbm_to_vmem [thread:$0]  (!%p1534_p11), %s1813_s3, 2048, %s1538_s18, [#allocation9], %s1422_s22, %s1422_s22, %s1423_s23  }
  0x46   : > { %s1269_s30 = scalar_lea.hbm %s1815_s5, 2048 }
  0x47   : > { %p1270_p6 = scmp.ne.s32.totalorder %s1815_s5, %s1269_s30  ;;  %p1276_p5 = scmp.lt.u32.totalorder %s1269_s30, %s1815_s5 }
  0x49   : > { %p1272_p10 = pnand %p1270_p6, %p1550_p13 }
  0x4b   : > { %p1273_p3 = pneg %p1272_p10 }
  0x4d   : > { %p1278_p7 = pnand %p1276_p5, %p1273_p3 }
  0x4f   : > { %1281 = shalt.err (!%p1278_p7)
}
  0x50   : > { %s1282_s15 = scalar_lea.vmem %s288_s20, 2048  ;;  %p1290_p1 = scmp.lt.s32.totalorder %s288_s20, %s288_s20 }
  0x51   : > { %p1283_p9 = scmp.ne.s32.totalorder %s288_s20, %s1282_s15  ;;  %p1291_p4 = scmp.lt.s32.totalorder %s1282_s15, %s1282_s15 }
  0x53   : > { %p1285_p12 = pnand %p1283_p9, %p1550_p13  ;;  %p1292_p8 = por %p1291_p4, %p1290_p1 }
  0x55   : > { %p1286_p0 = pneg %p1285_p12 }
  0x57   : > { %p1293_p2 = pnand %p1292_p8, %p1286_p0 }
  0x59   : > { %1296 = shalt.err (!%p1293_p2)
}
  0x5a   : > { %1134 = dma.hbm_to_vmem [thread:$0]  (!%p1534_p11), %s1815_s5, 2048, %s288_s20, [#allocation12], %s1422_s22, %s1422_s22, %s1423_s23  }
  0x5b   : > { %s44_s14 = sadd.s32 1, %s1405_s26  ;;  %s37_s16 = sadd.s32 1, %s1413_s28 }
  0x5c   : > { %p51_p2 = scmp.ne.s32.totalorder %s1405_s26, %s1401_s25  ;;  %p39_p8 = scmp.ge.s32.totalorder %s37_s16, 2 }
  0x5d   : > { %p52_p13 = scmp.eq.s32.totalorder %s1417_s29, 0  ;;  %p1836_p6 = scmp.ne.s32.totalorder %s1829_s10, 0 }
  0x5e   : > { %p1146_p3 = scmp.lt.s32.totalorder %s1417_s29, 2  ;;  %s1854_s16 = smov (%p39_p8, %s37_s16), 0 }
  0x5f   : > { %p1629_p10 = por %p1836_p6, %p51_p2  ;;  %p53_p5 = por %p52_p13, %p51_p2 }
  0x60   : > { %s304_s24 = sand.u32 1, %s1405_s26   ;;  %s41_s12 = ssub.s32 %s1413_s28, %s1854_s16 }
  0x61   : > { %p42_p7 = scmp.eq.s32.totalorder %s41_s12, 0  ;;  %s866_s20 = sshll.u32 %s304_s24, 3 }
  0x62   : > { %s867_s22 = sshll.u32 %s1413_s28, 7  ;;  %s308_s17 = scalar_lea.vmem [#allocation5], %s866_s20 }
  0x63   : > { %s1641_s23 = scalar_select %p42_p7, %s1405_s26, %s44_s14  }
  0x64   : > { %s1646_s10 = scalar_lea.hbm %s1810_s0, %s867_s22  ;;  %s315_s19 = sshll.u32 %s308_s17, 4  ;;  %s1648_s19 = int_to_ptr.vmem [resolvable:$true] %s315_s19 }
  0x65   : > { %p1652_p11 = pnand %p1146_p3, %p53_p5  ;;  %s305_s15 = scalar_lea.sflag [#allocation6], %s304_s24 }
  0x66   : > { %s1297_s18 = scalar_lea.hbm %s1646_s10, 128  ;;  %s1302_s12 = scalar_lea.hbm %s1810_s0, 256 }
  0x67   : > { %p1298_p9 = scmp.ne.s32.totalorder %s1646_s10, %s1297_s18  ;;  %p1299_p12 = pneg %p1652_p11 }
  0x68   : > { %p1303_p4 = scmp.lt.u32.totalorder %s1646_s10, %s1810_s0  ;;  %p1304_p2 = scmp.lt.u32.totalorder %s1302_s12, %s1297_s18 }
  0x69   : > { %p1300_p0 = pnand %p1299_p12, %p1298_p9  ;;  %p1306_p13 = scmp.lt.u32.totalorder %s1297_s18, %s1646_s10 }
  0x6a   : > { %p1305_p8 = por %p1304_p2, %p1303_p4 }
  0x6b   : > { %p1301_p1 = pneg %p1300_p0 }
  0x6c   : > { %p1307_p6 = por %p1306_p13, %p1305_p8 }
  0x6e   : > { %p1308_p3 = pnand %p1307_p6, %p1301_p1 }
  0x70   : > { %1311 = shalt.err (!%p1308_p3)
}
  0x71   : > { %s1312_s24 = scalar_lea.vmem %s1648_s19, 128  ;;  %s1424_s30 = smov [#allocation5]  }
  0x72   : > { %p1313_p5 = scmp.ne.s32.totalorder %s1648_s19, %s1312_s24  ;;  %s1317_s8 = sshll.u32 %s1424_s30, 4  ;;  %s1318_s8 = int_to_ptr.vmem [resolvable:$false] %s1317_s8 }
  0x73   : > { %s1319_s17 = scalar_lea.vmem %s1318_s8, 256  ;;  %p1320_p0 = scmp.lt.s32.totalorder %s1648_s19, %s1318_s8 }
  0x74   : > { %p1315_p7 = pnand %p1313_p5, %p1299_p12  ;;  %p1321_p4 = scmp.lt.s32.totalorder %s1319_s17, %s1312_s24 }
  0x76   : > { %p1316_p9 = pneg %p1315_p7  ;;  %p1322_p2 = por %p1321_p4, %p1320_p0 }
  0x78   : > { %p1323_p8 = pnand %p1322_p2, %p1316_p9 }
  0x7a   : > { %1326 = shalt.err (!%p1323_p8)
}
  0x7b   : > { %1138 = dma.hbm_to_vmem [thread:$0]  (!%p1652_p11), %s1646_s10, 128, %s1648_s19, %s305_s15  }
  0x7c   : > { %p1839_p1 = scmp.ne.s32.totalorder %s1833_s13, 0 }
  0x7d   : > { %s1684_s18 = sand.u32 (!%p1839_p1), 1, %s1401_s25   ;;  %p1840_p12 = scmp.ne.s32.totalorder (!%p1839_p1), %s1830_s11, 0 }
  0x7e   : > { %324 = sbr.rel (%p1839_p1) target bundleno = 1157 (0x485), region = 48  ;;  %s869_s6 = sshll.u32 (!%p1839_p1), %s1684_s18, 3 }
  0x7f   : > { %s327_s14 = scalar_lea.sflag (!%p1839_p1), [#allocation6], %s1684_s18  ;;  %s330_s12 = scalar_lea.vmem (!%p1839_p1), [#allocation5], %s869_s6 }
  0x85   : > { %1380 = dma.done.wait (%p1840_p12), %s327_s14, 128  }
  0x86   : > { %1382 = vsyncadd (%p1840_p12), %s327_s14, 4294967168  ;;  %p1841_p11 = scmp.ne.s32.totalorder %s1828_s9, 0 }
  0x88   : > { %1384 = dma.done.wait (%p1841_p11), [#allocation9], 4096  }
  0x89   : > { %1386 = vsyncadd (%p1841_p11), [#allocation9], 4294963200 }
  0x8a   : > { %1388 = dma.done.wait (%p1841_p11), [#allocation12], 2048  }
  0x8b   : > { %1390 = vsyncadd (%p1841_p11), [#allocation12], 4294965248  ;;  %v380_v0 = vlaneseq  ;;  %v1425_v1 = vmov 0.0|0.0   ;;  %v1707_v3 = vld [vmem:[%s330_s12] sm:$0xff]  ;;  %v405_v4 = vld [vmem:[#allocation8] sm:$0xff]  ;;  %vm1426_vm1 = vmmov 0  }
  0x8c   : > { %1037 = vmatprep.subr.bf16.mxu0 %v1425_v1  ;;  %1061 = vmatprep.subr.bf16.mxu1 %v1425_v1  ;;  %v406_v5 = vld [vmem:[#allocation8 + $0x8] sm:$0xff]  ;;  %v407_v8 = vld [vmem:[#allocation8 + $0x10] sm:$0xff]  ;;  %v408_v9 = vld [vmem:[#allocation8 + $0x18] sm:$0xff]  ;;  %v1427_v26 = vmov 0.0   ;;  %s1842_s15 = sld [smem:[#allocation20_spill]]  ;;  %s878_s20 = sshll.u32 %s1409_s27, 7 }
  0x8d   : > { %v1704_v2 = vand.u32 127, %v380_v0  ;;  %v1038_v7 = vpack.c.bf16 %v406_v5, %v405_v4  ;;  %v1041_v11 = vpack.c.bf16 %v408_v9, %v407_v8  ;;  %v409_v12 = vld [vmem:[#allocation8 + $0x20] sm:$0xff]  ;;  %v410_v13 = vld [vmem:[#allocation8 + $0x28] sm:$0xff]  ;;  %v411_v15 = vld [vmem:[#allocation8 + $0x30] sm:$0xff]  ;;  %964 = vmatprep.mubr.msk.f32.mxu0 %vm1426_vm1, %v1427_v26  ;;  %999 = vmatprep.mubr.msk.f32.mxu1 %vm1426_vm1, %v1427_v26  ;;  %s375_s22 = scalar_lea.vmem [#allocation13], %s869_s6  ;;  %s1843_s17 = sld [smem:[#allocation21_spill]] }
  0x8e   : > { %v1044_v14 = vpack.c.bf16 %v410_v13, %v409_v12  ;;  %v412_v16 = vld [vmem:[#allocation8 + $0x38] sm:$0xff]  ;;  %v413_v18 = vld [vmem:[#allocation8 + $0x40] sm:$0xff]  ;;  %v414_v19 = vld [vmem:[#allocation8 + $0x48] sm:$0xff]  ;;  %s735_s24 = sshll.u32 %s375_s22, 4  ;;  %s722_s12 = scalar_lea.sflag [#allocation7], %s1684_s18  ;;  %s1763_s24 = int_to_ptr.vmem [resolvable:$true] %s735_s24 }
  0x8f   : > { %vm382_vm0 = vcmp.lt.s32.totalorder %v1704_v2, 32  ;;  %1039 = vmatpush3.bf16.msra.mxu0 %v1038_v7  ;;  %v1047_v17 = vpack.c.bf16 %v412_v16, %v411_v15  ;;  %v1050_v20 = vpack.c.bf16 %v414_v19, %v413_v18  ;;  %v415_v21 = vld [vmem:[#allocation8 + $0x50] sm:$0xff]  ;;  %v416_v22 = vld [vmem:[#allocation8 + $0x58] sm:$0xff]  ;;  %v417_v24 = vld [vmem:[#allocation8 + $0x60] sm:$0xff]  ;;  %s1327_s27 = scalar_lea.vmem %s1763_s24, 128  ;;  %s1428_s6 = smov [#allocation13]  }
  0x90   : > { %v390_v6 = vsel %vm382_vm0, %v1707_v3, 0.0  ;;  %1040 = vmatprep.subr.bf16.mxu0 %v1425_v1  ;;  %v1053_v23 = vpack.c.bf16 %v416_v22, %v415_v21  ;;  %v418_v25 = vld [vmem:[#allocation8 + $0x68] sm:$0xff]  ;;  %v419_v28 = vld [vmem:[#allocation8 + $0x70] sm:$0xff]  ;;  %v420_v29 = vld [vmem:[#allocation8 + $0x78] sm:$0xff]  ;;  %p1328_p13 = scmp.ne.s32.totalorder %s1763_s24, %s1327_s27  ;;  %s1331_s9 = sshll.u32 %s1428_s6, 4  ;;  %s1332_s9 = int_to_ptr.vmem [resolvable:$false] %s1331_s9 }
  0x91   : > { %391 = vadd.xlane.f32.xlu0 %v390_v6  ;;  %v394_v10 = vmul.f32 %v390_v6, %v390_v6  ;;  %v1056_v27 = vpack.c.bf16 %v418_v25, %v417_v24  ;;  %v1059_v30 = vpack.c.bf16 %v420_v29, %v419_v28  ;;  %v519_v42 = vld [vmem:[#allocation10] sm:$0xff]  ;;  %v520_v43 = vld [vmem:[#allocation10 + $0x8] sm:$0xff]  ;;  %v521_v44 = vld [vmem:[#allocation10 + $0x10] sm:$0xff]  ;;  %s1333_s11 = scalar_lea.vmem %s1332_s9, 256  ;;  %p1334_p5 = scmp.lt.s32.totalorder %s1763_s24, %s1332_s9 }
  0x92   : > { %v1062_v45 = vpack.c.bf16 %v520_v43, %v519_v42  ;;  %v522_v46 = vld [vmem:[#allocation10 + $0x18] sm:$0xff]  ;;  %v874_v49 = vld [vmem:[%s1812_s2] ss:$0 sm:$0xff]  ;;  %v523_v55 = vld [vmem:[#allocation10 + $0x20] sm:$0xff]  ;;  %p1329_p6 = pnand %p1328_p13, %p1629_p10  ;;  %p1335_p7 = scmp.lt.s32.totalorder %s1333_s11, %s1327_s27 }
  0x93   : > { %1042 = vmatpush3.bf16.msra.mxu0 %v1041_v11  ;;  %v1065_v47 = vpack.c.bf16 %v522_v46, %v521_v44  ;;  %v524_v56 = vld [vmem:[#allocation10 + $0x28] sm:$0xff]  ;;  %v525_v58 = vld [vmem:[#allocation10 + $0x30] sm:$0xff]  ;;  %v526_v59 = vld [vmem:[#allocation10 + $0x38] sm:$0xff]  ;;  %s1761_s14 = scalar_lea.hbm %s1843_s17, %s878_s20 }
  0x94   : > { %1043 = vmatprep.subr.bf16.mxu0 %v1425_v1  ;;  %1063 = vmatpush3.bf16.msra.mxu1 %v1062_v45  ;;  %v1068_v57 = vpack.c.bf16 %v524_v56, %v523_v55  ;;  %v1071_v60 = vpack.c.bf16 %v526_v59, %v525_v58  ;;  %v527_v61 = vld [vmem:[#allocation10 + $0x40] sm:$0xff]  ;;  %v528_v62 = vld [vmem:[#allocation10 + $0x48] sm:$0xff]  ;;  %v529_v0 = vld [vmem:[#allocation10 + $0x50] sm:$0xff]  ;;  %p1330_p3 = pneg %p1329_p6  ;;  %p1336_p9 = por %p1335_p7, %p1334_p5 }
  0x95   : > { %395 = vadd.xlane.f32.xlu0 %v394_v10  ;;  %1064 = vmatprep.subr.bf16.mxu1 %v1425_v1  ;;  %v1074_v63 = vpack.c.bf16 %v528_v62, %v527_v61  ;;  %v530_v2 = vld [vmem:[#allocation10 + $0x58] sm:$0xff]  ;;  %v531_v4 = vld [vmem:[#allocation10 + $0x60] sm:$0xff]  ;;  %v532_v5 = vld [vmem:[#allocation10 + $0x68] sm:$0xff] }
  0x96   : > { %v1080_v6 = vpack.c.bf16 %v532_v5, %v531_v4  ;;  %v533_v7 = vld [vmem:[#allocation10 + $0x70] sm:$0xff]  ;;  %v534_v8 = vld [vmem:[#allocation10 + $0x78] sm:$0xff]  ;;  %v618_v10 = vld [vmem:[#allocation11] sm:$0xff]  ;;  %p1337_p0 = pnand %p1336_p9, %p1330_p3 }
  0x97   : > { %1045 = vmatpush3.bf16.msra.mxu0 %v1044_v14  ;;  %v1083_v9 = vpack.c.bf16 %v534_v8, %v533_v7  ;;  %v619_v11 = vld [vmem:[#allocation11 + $0x8] sm:$0xff]  ;;  %v620_v12 = vld [vmem:[#allocation11 + $0x10] sm:$0xff]  ;;  %v621_v14 = vld [vmem:[#allocation11 + $0x18] sm:$0xff] }
  0x98   : > { %1046 = vmatprep.subr.bf16.mxu0 %v1425_v1  ;;  %1066 = vmatpush3.bf16.msra.mxu1 %v1065_v47  ;;  %v1086_v13 = vpack.c.bf16 %v619_v11, %v618_v10  ;;  %v1089_v15 = vpack.c.bf16 %v621_v14, %v620_v12  ;;  %v622_v16 = vld [vmem:[#allocation11 + $0x20] sm:$0xff]  ;;  %v632_v42 = vld [vmem:[#allocation11 + $0x70] sm:$0xff]  ;;  %v633_v43 = vld [vmem:[#allocation11 + $0x78] sm:$0xff] }
  0x99   : > { %1067 = vmatprep.subr.bf16.mxu1 %v1425_v1  ;;  %v1107_v44 = vpack.c.bf16 %v633_v43, %v632_v42  ;;  %v875_v45 = vld [vmem:[%s1814_s4] ss:$0 sm:$0xff] }
  0x9a   : > { %v876_v55 = vld [vmem:[%s1842_s15] ss:$0 sm:$0xff] }
  0x9b   : > { %1048 = vmatpush3.bf16.msra.mxu0 %v1047_v17  ;;  %v623_v17 = vld [vmem:[#allocation11 + $0x28] sm:$0xff] }
  0x9c   : > { %1049 = vmatprep.subr.bf16.mxu0 %v1425_v1  ;;  %1069 = vmatpush3.bf16.msra.mxu1 %v1068_v57  ;;  %v1092_v18 = vpack.c.bf16 %v623_v17, %v622_v16 }
  0x9d   : > { %1070 = vmatprep.subr.bf16.mxu1 %v1425_v1 }
  0x9f   : > { %1051 = vmatpush3.bf16.msra.mxu0 %v1050_v20 }
  0xa0   : > { %1052 = vmatprep.subr.bf16.mxu0 %v1425_v1  ;;  %1072 = vmatpush3.bf16.msra.mxu1 %v1071_v60 }
  0xa1   : > { %1073 = vmatprep.subr.bf16.mxu1 %v1425_v1 }
  0xa3   : > { %1054 = vmatpush3.bf16.msra.mxu0 %v1053_v23 }
  0xa4   : > { %1055 = vmatprep.subr.bf16.mxu0 %v1425_v1  ;;  %1075 = vmatpush3.bf16.msra.mxu1 %v1074_v63 }
  0xa5   : > { %1076 = vmatprep.subr.bf16.mxu1 %v1425_v1 }
  0xa7   : > { %1057 = vmatpush3.bf16.msra.mxu0 %v1056_v27 }
  0xa8   : > { %1058 = vmatprep.subr.bf16.mxu0 %v1425_v1 }
  0xab   : > { %1060 = vmatpush3.bf16.msra.mxu0 %v1059_v30  ;;  %v624_v30 = vld [vmem:[#allocation11 + $0x30] sm:$0xff] }
  0xac   : > { %1085 = vmatprep.subr.bf16.mxu0 %v1425_v1 }
 0x11e   : > { %v392_v31 = vpop.xlane.xlu0 %391 }
 0x11f   : > { %v393_v32 = vmul.f32 0.03125, %v392_v31  ;;  %v625_v31 = vld [vmem:[#allocation11 + $0x38] sm:$0xff] }
 0x121   : > { %v398_v34 = vmul.f32 %v393_v32, %v393_v32  ;;  %v401_v39 = vsub.f32 %v1707_v3, %v393_v32  ;;  %v1095_v32 = vpack.c.bf16 %v625_v31, %v624_v30 }
 0x122   : > { %v396_v33 = vpop.xlane.xlu0 %395 }
 0x123   : > { %v397_v35 = vmul.f32 0.03125, %v396_v33  ;;  %v626_v33 = vld [vmem:[#allocation11 + $0x40] sm:$0xff] }
 0x125   : > { %v399_v36 = vsub.f32 %v397_v35, %v398_v34  ;;  %v627_v34 = vld [vmem:[#allocation11 + $0x48] sm:$0xff] }
 0x126   : > { %v1098_v35 = vpack.c.bf16 %v627_v34, %v626_v33 }
 0x127   : > { %v400_v37 = vmax.f32 %v399_v36, 0.0  ;;  %v628_v36 = vld [vmem:[#allocation11 + $0x50] sm:$0xff] }
 0x129   : > { %v402_v38 = vadd.f32 1e-05, %v400_v37  ;;  %v629_v37 = vld [vmem:[#allocation11 + $0x58] sm:$0xff] }
 0x12b   : > { %1207 = vrsqrt.f32 %v402_v38  ;;  %v1101_v38 = vpack.c.bf16 %v629_v37, %v628_v36 }
 0x135   : > { %v1208_v40 = vpop.eup %1207 }
 0x136   : > { %v404_v41 = vmul.f32 %v1208_v40, %v401_v39  ;;  %v630_v39 = vld [vmem:[#allocation11 + $0x60] sm:$0xff]  ;;  %v631_v40 = vld [vmem:[#allocation11 + $0x68] sm:$0xff] }
 0x138   : > { %965 = vmatmul.mubr.f32.vlgmr.msra.gmra.mrb[0].mxu0 %v404_v41  ;;  %v1104_v41 = vpack.c.bf16 %v631_v40, %v630_v39 }
 0x139   : > { %1034 = vmatprep.mubr.msk.f32.mxu0 %vm1426_vm1, %v1427_v26  ;;  %1087 = vmatpush3.bf16.msra.mxu0 %v1086_v13 }
 0x13a   : > { %1088 = vmatprep.subr.bf16.mxu0 %v1425_v1 }
 0x13d   : > { %1090 = vmatpush3.bf16.msra.mxu0 %v1089_v15 }
 0x13e   : > { %1091 = vmatprep.subr.bf16.mxu0 %v1425_v1 }
 0x141   : > { %1093 = vmatpush3.bf16.msra.mxu0 %v1092_v18 }
 0x142   : > { %1094 = vmatprep.subr.bf16.mxu0 %v1425_v1 }
 0x145   : > { %1096 = vmatpush3.bf16.msra.mxu0 %v1095_v32 }
 0x146   : > { %1097 = vmatprep.subr.bf16.mxu0 %v1425_v1 }
 0x149   : > { %1099 = vmatpush3.bf16.msra.mxu0 %v1098_v35 }
 0x14a   : > { %1100 = vmatprep.subr.bf16.mxu0 %v1425_v1 }
 0x14d   : > { %1102 = vmatpush3.bf16.msra.mxu0 %v1101_v38 }
 0x14e   : > { %1103 = vmatprep.subr.bf16.mxu0 %v1425_v1 }
 0x151   : > { %1105 = vmatpush3.bf16.msra.mxu0 %v1104_v41 }
 0x152   : > { %1106 = vmatprep.subr.bf16.mxu0 %v1425_v1 }
 0x155   : > { %1108 = vmatpush3.bf16.msra.mxu0 %v1107_v44 }
 0x20b   : > { %v487_v48 = vpop.f32.mrb[0].mxu0 }
 0x20c   : > { %v491_v50 = vadd.f32 %v487_v48, %v1707_v3  ;;  %v966_v51 = vpop.f32.mrb[1].mxu0  ;;  %v1077_v3 = vpack.c.bf16 %v530_v2, %v529_v0 }
 0x20e   : > { %v1730_v52 = vadd.f32 %v874_v49, %v491_v50  ;;  %1078 = vmatpush3.bf16.msra.mxu1 %v1077_v3 }
 0x20f   : > { %1079 = vmatprep.subr.bf16.mxu1 %v1425_v1 }
 0x210   : > { %v501_v53 = vsel %vm382_vm0, %v1730_v52, 0.0 }
 0x211   : > { %502 = vadd.xlane.f32.xlu1 %v501_v53  ;;  %v505_v54 = vmul.f32 %v501_v53, %v501_v53 }
 0x212   : > { %1081 = vmatpush3.bf16.msra.mxu1 %v1080_v6 }
 0x213   : > { %1082 = vmatprep.subr.bf16.mxu1 %v1425_v1 }
 0x215   : > { %506 = vadd.xlane.f32.xlu1 %v505_v54 }
 0x216   : > { %1084 = vmatpush3.bf16.msra.mxu1 %v1083_v9 }
 0x29e   : > { %v503_v19 = vpop.xlane.xlu1 %502 }
 0x29f   : > { %v504_v20 = vmul.f32 0.03125, %v503_v19 }
 0x2a1   : > { %v509_v22 = vmul.f32 %v504_v20, %v504_v20  ;;  %v512_v27 = vsub.f32 %v1730_v52, %v504_v20 }
 0x2a2   : > { %v507_v21 = vpop.xlane.xlu1 %506 }
 0x2a3   : > { %v508_v23 = vmul.f32 0.03125, %v507_v21 }
 0x2a5   : > { %v510_v24 = vsub.f32 %v508_v23, %v509_v22 }
 0x2a7   : > { %v511_v25 = vmax.f32 %v510_v24, 0.0 }
 0x2a9   : > { %v513_v26 = vadd.f32 1e-05, %v511_v25 }
 0x2ab   : > { %1209 = vrsqrt.f32 %v513_v26 }
 0x2b5   : > { %v1210_v28 = vpop.eup %1209 }
 0x2b6   : > { %v515_v29 = vmul.f32 %v1210_v28, %v512_v27 }
 0x2b8   : > { %1000 = vmatmul.mubr.f32.vlgmr.msra.gmra.mrb[0].mxu1 %v515_v29 }
 0x38b   : > { %v608_v46 = vpop.f32.mrb[0].mxu1 }
 0x38c   : > { %v609_v47 = vadd.f32 %v875_v45, %v608_v46  ;;  %v1001_v48 = vpop.f32.mrb[1].mxu1 }
 0x38e   : > { %v613_v49 = vmul.f32 0.70710677, %v609_v47  ;;  %v612_v51 = vmul.f32 0.5, %v609_v47 }
 0x390   : > { %1211 = verf.f32 %v613_v49 }
 0x39a   : > { %v1212_v50 = vpop.eup %1211 }
 0x39b   : > { %v615_v53 = vadd.f32 1.0, %v1212_v50 }
 0x39d   : > { %v616_v1 = vmul.f32 %v615_v53, %v612_v51 }
 0x39f   : > { %1035 = vmatmul.mubr.f32.vlgmr.msra.gmra.mrb[2].mxu0 %v616_v1 }
 0x472   : > { %v700_v54 = vpop.f32.mrb[2].mxu0 }
 0x473   : > { %v711_v56 = vadd.f32 %v700_v54, %v1730_v52  ;;  %v1036_v57 = vpop.f32.mrb[3].mxu0 }
 0x475   : > { %v719_v58 = vadd.f32 %v876_v55, %v711_v56 }
 0x477   : > { %720 = vst [vmem:[%s375_s22] sm:$0xff] %v719_v58 }
 0x478   : > { %1340 = shalt.err (!%p1337_p0)
}
 0x479   : > { %s1341_s18 = scalar_lea.hbm %s1761_s14, 128  ;;  %s1345_s19 = scalar_lea.hbm %s1843_s17, 256 }
 0x47a   : > { %p1342_p4 = scmp.ne.s32.totalorder %s1761_s14, %s1341_s18  ;;  %p1346_p1 = scmp.lt.u32.totalorder %s1761_s14, %s1843_s17 }
 0x47b   : > { %p1347_p12 = scmp.lt.u32.totalorder %s1345_s19, %s1341_s18  ;;  %p1349_p13 = scmp.lt.u32.totalorder %s1341_s18, %s1761_s14 }
 0x47c   : > { %p1343_p2 = pnand %p1342_p4, %p1629_p10 }
 0x47d   : > { %p1348_p11 = por %p1347_p12, %p1346_p1 }
 0x47e   : > { %p1344_p8 = pneg %p1343_p2 }
 0x47f   : > { %p1350_p6 = por %p1349_p13, %p1348_p11 }
 0x481   : > { %p1351_p3 = pnand %p1350_p6, %p1344_p8 }
 0x483   : > { %1354 = shalt.err (!%p1351_p3)
}
 0x484   : > { %1123 = dma.vmem_to_hbm [thread:$0]  (%p1629_p10), %s1763_s24, 128, %s1761_s14, %s722_s12  }
 0x485 PF: > { %s1844_s20 = sld [smem:[#allocation18_spill]]  ;;  %s1845_s22 = sld [smem:[#allocation19_spill]] }
 0x486   : > { %p1847_p7 = scmp.ge.s32.totalorder %s1417_s29, 2 }
 0x48b   : > { %s747_s30 = sand.u32 1, %s1844_s20   ;;  %p1846_p5 = scmp.ne.s32.totalorder %s1845_s22, 0 }
 0x48c   : > { %s748_s8 = scalar_lea.sflag [#allocation7], %s747_s30 }
 0x48d   : > { %p1140_p9 = pnand %p1847_p7, %p1846_p5 }
 0x48f   : > { %1392 = dma.done.wait (!%p1140_p9), %s748_s8, 128  }
 0x490   : > { %1394 = vsyncadd (!%p1140_p9), %s748_s8, 4294967168  ;;  %s25_s29 = sadd.s32 1, %s1417_s29   ;;  %s1848_s24 = smov %s1401_s25 }
 0x491   : > { %p22_p0 = scmp.ge.s32.totalorder %s25_s29, 4   ;;  %s1849_s25 = smov %s1405_s26 }
 0x492   : > { %s1850_s26 = smov %s1641_s23  ;;  %s1851_s27 = smov %s1413_s28 }
 0x493   : > { %s1852_s28 = smov %s1854_s16  ;;  %24 = sbr.rel (!%p22_p0) target bundleno = 11 (0xb), region = 118 }
 0x49a   :  { %753 = vsyncpa [#allocation6], 1 }
 0x49b   :  { %755 = vsyncpa [#allocation6 + $0x1], 1 }
 0x49c   :  { %756 = vsyncpa [#allocation9], 1 }
 0x49d   :  { %757 = vsyncpa [#allocation12], 1 }
 0x49e   :  { %758 = vsyncpa [#allocation7], 1 }
 0x49f   :  { %760 = vsyncpa [#allocation7 + $0x1], 1 }

// kernel: tpu_custom_call.1
= control target key start
LH: loop header
LB: loop body
LE: loop exit
PB: predicated region body
PF: predicated region fallthrough
CT: control target
= control target key end

     0   :  { %s1810_s0 = inlined_call_operand.hbm [shape: f32[16,128], index: 0, kind: input, shape index: {}]   ;;  %s1811_s1 = inlined_call_operand.hbm [shape: f32[128,128], index: 1, kind: input, shape index: {}]   ;;  %s1812_s2 = inlined_call_operand.vmem [shape: f32[1,128], index: 2, kind: input, shape index: {}]   ;;  %s1813_s3 = inlined_call_operand.hbm [shape: f32[128,128], index: 3, kind: input, shape index: {}]   ;;  %s1814_s4 = inlined_call_operand.vmem [shape: f32[1,128], index: 4, kind: input, shape index: {}]   ;;  %s1815_s5 = inlined_call_operand.hbm [shape: f32[128,128], index: 5, kind: input, shape index: {}]   ;;  %s1816_s6 = inlined_call_operand.vmem [shape: f32[1,128], index: 6, kind: input, shape index: {}]   ;;  %s1817_s7 = inlined_call_operand.hbm [shape: f32[16,128], index: 7, kind: output, shape index: {}]  }
   0x1   :  { %1825 = sst [smem:[#allocation20_spill]] %s1816_s6 }
   0x2   :  { %1826 = sst [smem:[#allocation21_spill]] %s1817_s7 }
   0x3   :  { %12 = vsyncpa [#allocation6], 0 }
   0x4   :  { %14 = vsyncpa [#allocation6 + $0x1], 0 }
   0x5   :  { %15 = vsyncpa [#allocation9], 0 }
   0x6   :  { %16 = vsyncpa [#allocation12], 0 }
   0x7   :  { %17 = vsyncpa [#allocation7], 0 }
   0x8   :  { %19 = vsyncpa [#allocation7 + $0x1], 0  ;;  %s1469_s24 = smov 0   ;;  %s1471_s25 = smov 0  }
   0x9   :  { %s1473_s26 = smov 0   ;;  %s1475_s27 = smov 0  }
   0xa   :  { %s1477_s28 = smov 0   ;;  %s1479_s29 = smov 0  }
   0xb LB: > { %1827 = sst [smem:[#allocation18_spill]] %s1397_s24  ;;  %s858_s30 = sadd.s32 4294967295, %s1417_s29   ;;  %s1417_s29 = sphi %s1479_s29, %s25_s29   ;;  %s1413_s28 = sphi %s1477_s28, %s1852_s28   ;;  %s1409_s27 = sphi %s1475_s27, %s1851_s27   ;;  %s1405_s26 = sphi %s1473_s26, %s1850_s26   ;;  %s1401_s25 = sphi %s1471_s25, %s1849_s25   ;;  %s1397_s24 = sphi %s1469_s24, %s1848_s24  }
   0xc   : > { %s859_s8 = sadd.s32 4294967294, %s1417_s29   ;;  %p57_p0 = scmp.ne.s32.totalorder %s1401_s25, %s1397_s24 }
   0xd   : > { %p1503_p1 = scmp.eq.s32.totalorder %s858_s30, 0  ;;  %p1507_p2 = scmp.eq.s32.totalorder %s858_s30, 1 }
   0xe   : > { %p228_p3 = scmp.eq.s32.totalorder %s859_s8, 1  ;;  %p860_p5 = scmp.ge.s32.totalorder %s1417_s29, 1 }
   0xf   : > { %s1828_s9 = scalar_select %p1503_p1, 1, 0 }
  0x10   : > { %s1829_s10 = scalar_select %p1507_p2, 1, 0 }
  0x11   : > { %p1513_p4 = por %p1503_p1, %p57_p0  ;;  %p1518_p6 = por %p228_p3, %p57_p0 }
  0x12   : > { %p235_p7 = scmp.lt.s32.totalorder %s1417_s29, 3  ;;  %s1419_s14 = smov [#allocation8]  }
  0x13   : > { %s1830_s11 = scalar_select %p1513_p4, 1, 0 }
  0x14   : > { %s1831_s12 = scalar_select %p1518_p6, 1, 0 }
  0x15   : > { %p1523_p8 = pnand %p860_p5, %p235_p7  ;;  %s247_s15 = sshll.u32 %s1419_s14, 4  ;;  %s1527_s15 = int_to_ptr.vmem [resolvable:$true] %s247_s15 }
  0x16   : > { %1832 = sst [smem:[#allocation19_spill]] %s1831_s12  ;;  %s1420_s17 = smov [#allocation10]  }
  0x17   : > { %s1833_s13 = scalar_select %p1523_p8, 1, 0 }
  0x18   : > { %p1125_p9 = pneg %p1523_p8  ;;  %s265_s18 = sshll.u32 %s1420_s17, 4  ;;  %s1538_s18 = int_to_ptr.vmem [resolvable:$true] %s265_s18 }
  0x19   : > { %s1421_s19 = smov [#allocation11]   ;;  %s1213_s23 = scalar_lea.hbm %s1811_s1, 2048 }
  0x1a   : > { %p1534_p11 = pnand %p1125_p9, %p1503_p1  ;;  %s1540_s20 = sshll.u32 %s1421_s19, 4  ;;  %s288_s20 = int_to_ptr.vmem [resolvable:$true] %s1540_s20 }
  0x1b   : > { %p1214_p12 = scmp.ne.s32.totalorder %s1811_s1, %s1213_s23  ;;  %p1220_p5 = scmp.lt.u32.totalorder %s1213_s23, %s1811_s1 }
  0x1c   : > { %p1550_p13 = pneg %p1534_p11 }
  0x1e   : > { %p1216_p0 = pnand %p1550_p13, %p1214_p12 }
  0x20   : > { %p1217_p3 = pneg %p1216_p0 }
  0x22   : > { %p1222_p7 = pnand %p1220_p5, %p1217_p3 }
  0x24   : > { %1225 = shalt.err (!%p1222_p7)
}
  0x25   : > { %s1226_s21 = scalar_lea.vmem %s1527_s15, 2048  ;;  %p1234_p1 = scmp.lt.s32.totalorder %s1527_s15, %s1527_s15 }
  0x26   : > { %p1227_p9 = scmp.ne.s32.totalorder %s1527_s15, %s1226_s21  ;;  %p1235_p4 = scmp.lt.s32.totalorder %s1226_s21, %s1226_s21 }
  0x28   : > { %p1229_p10 = pnand %p1227_p9, %p1550_p13  ;;  %p1236_p12 = por %p1235_p4, %p1234_p1 }
  0x2a   : > { %p1230_p6 = pneg %p1229_p10 }
  0x2c   : > { %p1237_p0 = pnand %p1236_p12, %p1230_p6 }
  0x2e   : > { %1240 = shalt.err (!%p1237_p0)
}
  0x2f   : > { %s1422_s22 = smov 128   ;;  %s1423_s23 = smov 8  }
  0x30   : > { %1128 = dma.hbm_to_vmem [thread:$0]  (!%p1534_p11), %s1811_s1, 2048, %s1527_s15, [#allocation9], %s1422_s22, %s1422_s22, %s1423_s23  }
  0x31   : > { %s1241_s21 = scalar_lea.hbm %s1813_s3, 2048 }
  0x32   : > { %p1242_p1 = scmp.ne.s32.totalorder %s1813_s3, %s1241_s21  ;;  %p1248_p10 = scmp.lt.u32.totalorder %s1241_s21, %s1813_s3 }
  0x34   : > { %p1244_p4 = pnand %p1242_p1, %p1550_p13 }
  0x36   : > { %p1245_p6 = pneg %p1244_p4 }
  0x38   : > { %p1250_p3 = pnand %p1248_p10, %p1245_p6 }
  0x3a   : > { %1253 = shalt.err (!%p1250_p3)
}
  0x3b   : > { %s1254_s15 = scalar_lea.vmem %s1538_s18, 2048  ;;  %p1262_p12 = scmp.lt.s32.totalorder %s1538_s18, %s1538_s18 }
  0x3c   : > { %p1255_p5 = scmp.ne.s32.totalorder %s1538_s18, %s1254_s15  ;;  %p1263_p0 = scmp.lt.s32.totalorder %s1254_s15, %s1254_s15 }
  0x3e   : > { %p1257_p7 = pnand %p1255_p5, %p1550_p13  ;;  %p1264_p1 = por %p1263_p0, %p1262_p12 }
  0x40   : > { %p1258_p9 = pneg %p1257_p7 }
  0x42   : > { %p1265_p4 = pnand %p1264_p1, %p1258_p9 }
  0x44   : > { %1268 = shalt.err (!%p1265_p4)
}
  0x45   : > { %1131 = dma.hbm_to_vmem [thread:$0]  (!%p1534_p11), %s1813_s3, 2048, %s1538_s18, [#allocation9], %s1422_s22, %s1422_s22, %s1423_s23  }
  0x46   : > { %s1269_s30 = scalar_lea.hbm %s1815_s5, 2048 }
  0x47   : > { %p1270_p6 = scmp.ne.s32.totalorder %s1815_s5, %s1269_s30  ;;  %p1276_p5 = scmp.lt.u32.totalorder %s1269_s30, %s1815_s5 }
  0x49   : > { %p1272_p10 = pnand %p1270_p6, %p1550_p13 }
  0x4b   : > { %p1273_p3 = pneg %p1272_p10 }
  0x4d   : > { %p1278_p7 = pnand %p1276_p5, %p1273_p3 }
  0x4f   : > { %1281 = shalt.err (!%p1278_p7)
}
  0x50   : > { %s1282_s15 = scalar_lea.vmem %s288_s20, 2048  ;;  %p1290_p1 = scmp.lt.s32.totalorder %s288_s20, %s288_s20 }
  0x51   : > { %p1283_p9 = scmp.ne.s32.totalorder %s288_s20, %s1282_s15  ;;  %p1291_p4 = scmp.lt.s32.totalorder %s1282_s15, %s1282_s15 }
  0x53   : > { %p1285_p12 = pnand %p1283_p9, %p1550_p13  ;;  %p1292_p8 = por %p1291_p4, %p1290_p1 }
  0x55   : > { %p1286_p0 = pneg %p1285_p12 }
  0x57   : > { %p1293_p2 = pnand %p1292_p8, %p1286_p0 }
  0x59   : > { %1296 = shalt.err (!%p1293_p2)
}
  0x5a   : > { %1134 = dma.hbm_to_vmem [thread:$0]  (!%p1534_p11), %s1815_s5, 2048, %s288_s20, [#allocation12], %s1422_s22, %s1422_s22, %s1423_s23  }
  0x5b   : > { %s44_s14 = sadd.s32 1, %s1405_s26  ;;  %s37_s16 = sadd.s32 1, %s1413_s28 }
  0x5c   : > { %p51_p2 = scmp.ne.s32.totalorder %s1405_s26, %s1401_s25  ;;  %p39_p8 = scmp.ge.s32.totalorder %s37_s16, 2 }
  0x5d   : > { %p52_p13 = scmp.eq.s32.totalorder %s1417_s29, 0  ;;  %p1836_p6 = scmp.ne.s32.totalorder %s1829_s10, 0 }
  0x5e   : > { %p1146_p3 = scmp.lt.s32.totalorder %s1417_s29, 2  ;;  %s1854_s16 = smov (%p39_p8, %s37_s16), 0 }
  0x5f   : > { %p1629_p10 = por %p1836_p6, %p51_p2  ;;  %p53_p5 = por %p52_p13, %p51_p2 }
  0x60   : > { %s304_s24 = sand.u32 1, %s1405_s26   ;;  %s41_s12 = ssub.s32 %s1413_s28, %s1854_s16 }
  0x61   : > { %p42_p7 = scmp.eq.s32.totalorder %s41_s12, 0  ;;  %s866_s20 = sshll.u32 %s304_s24, 3 }
  0x62   : > { %s867_s22 = sshll.u32 %s1413_s28, 7  ;;  %s308_s17 = scalar_lea.vmem [#allocation5], %s866_s20 }
  0x63   : > { %s1641_s23 = scalar_select %p42_p7, %s1405_s26, %s44_s14  }
  0x64   : > { %s1646_s10 = scalar_lea.hbm %s1810_s0, %s867_s22  ;;  %s315_s19 = sshll.u32 %s308_s17, 4  ;;  %s1648_s19 = int_to_ptr.vmem [resolvable:$true] %s315_s19 }
  0x65   : > { %p1652_p11 = pnand %p1146_p3, %p53_p5  ;;  %s305_s15 = scalar_lea.sflag [#allocation6], %s304_s24 }
  0x66   : > { %s1297_s18 = scalar_lea.hbm %s1646_s10, 128  ;;  %s1302_s12 = scalar_lea.hbm %s1810_s0, 256 }
  0x67   : > { %p1298_p9 = scmp.ne.s32.totalorder %s1646_s10, %s1297_s18  ;;  %p1299_p12 = pneg %p1652_p11 }
  0x68   : > { %p1303_p4 = scmp.lt.u32.totalorder %s1646_s10, %s1810_s0  ;;  %p1304_p2 = scmp.lt.u32.totalorder %s1302_s12, %s1297_s18 }
  0x69   : > { %p1300_p0 = pnand %p1299_p12, %p1298_p9  ;;  %p1306_p13 = scmp.lt.u32.totalorder %s1297_s18, %s1646_s10 }
  0x6a   : > { %p1305_p8 = por %p1304_p2, %p1303_p4 }
  0x6b   : > { %p1301_p1 = pneg %p1300_p0 }
  0x6c   : > { %p1307_p6 = por %p1306_p13, %p1305_p8 }
  0x6e   : > { %p1308_p3 = pnand %p1307_p6, %p1301_p1 }
  0x70   : > { %1311 = shalt.err (!%p1308_p3)
}
  0x71   : > { %s1312_s24 = scalar_lea.vmem %s1648_s19, 128  ;;  %s1424_s30 = smov [#allocation5]  }
  0x72   : > { %p1313_p5 = scmp.ne.s32.totalorder %s1648_s19, %s1312_s24  ;;  %s1317_s8 = sshll.u32 %s1424_s30, 4  ;;  %s1318_s8 = int_to_ptr.vmem [resolvable:$false] %s1317_s8 }
  0x73   : > { %s1319_s17 = scalar_lea.vmem %s1318_s8, 256  ;;  %p1320_p0 = scmp.lt.s32.totalorder %s1648_s19, %s1318_s8 }
  0x74   : > { %p1315_p7 = pnand %p1313_p5, %p1299_p12  ;;  %p1321_p4 = scmp.lt.s32.totalorder %s1319_s17, %s1312_s24 }
  0x76   : > { %p1316_p9 = pneg %p1315_p7  ;;  %p1322_p2 = por %p1321_p4, %p1320_p0 }
  0x78   : > { %p1323_p8 = pnand %p1322_p2, %p1316_p9 }
  0x7a   : > { %1326 = shalt.err (!%p1323_p8)
}
  0x7b   : > { %1138 = dma.hbm_to_vmem [thread:$0]  (!%p1652_p11), %s1646_s10, 128, %s1648_s19, %s305_s15  }
  0x7c   : > { %p1839_p1 = scmp.ne.s32.totalorder %s1833_s13, 0 }
  0x7d   : > { %s1684_s18 = sand.u32 (!%p1839_p1), 1, %s1401_s25   ;;  %p1840_p12 = scmp.ne.s32.totalorder (!%p1839_p1), %s1830_s11, 0 }
  0x7e   : > { %324 = sbr.rel (%p1839_p1) target bundleno = 1157 (0x485), region = 48  ;;  %s869_s6 = sshll.u32 (!%p1839_p1), %s1684_s18, 3 }
  0x7f   : > { %s327_s14 = scalar_lea.sflag (!%p1839_p1), [#allocation6], %s1684_s18  ;;  %s330_s12 = scalar_lea.vmem (!%p1839_p1), [#allocation5], %s869_s6 }
  0x85   : > { %1380 = dma.done.wait (%p1840_p12), %s327_s14, 128  }
  0x86   : > { %1382 = vsyncadd (%p1840_p12), %s327_s14, 4294967168  ;;  %p1841_p11 = scmp.ne.s32.totalorder %s1828_s9, 0 }
  0x88   : > { %1384 = dma.done.wait (%p1841_p11), [#allocation9], 4096  }
  0x89   : > { %1386 = vsyncadd (%p1841_p11), [#allocation9], 4294963200 }
  0x8a   : > { %1388 = dma.done.wait (%p1841_p11), [#allocation12], 2048  }
  0x8b   : > { %1390 = vsyncadd (%p1841_p11), [#allocation12], 4294965248  ;;  %v380_v0 = vlaneseq  ;;  %v1425_v1 = vmov 0.0|0.0   ;;  %v1707_v3 = vld [vmem:[%s330_s12] sm:$0xff]  ;;  %v405_v4 = vld [vmem:[#allocation8] sm:$0xff]  ;;  %vm1426_vm1 = vmmov 0  }
  0x8c   : > { %1037 = vmatprep.subr.bf16.mxu0 %v1425_v1  ;;  %1061 = vmatprep.subr.bf16.mxu1 %v1425_v1  ;;  %v406_v5 = vld [vmem:[#allocation8 + $0x8] sm:$0xff]  ;;  %v407_v8 = vld [vmem:[#allocation8 + $0x10] sm:$0xff]  ;;  %v408_v9 = vld [vmem:[#allocation8 + $0x18] sm:$0xff]  ;;  %v1427_v26 = vmov 0.0   ;;  %s1842_s15 = sld [smem:[#allocation20_spill]]  ;;  %s878_s20 = sshll.u32 %s1409_s27, 7 }
  0x8d   : > { %v1704_v2 = vand.u32 127, %v380_v0  ;;  %v1038_v7 = vpack.c.bf16 %v406_v5, %v405_v4  ;;  %v1041_v11 = vpack.c.bf16 %v408_v9, %v407_v8  ;;  %v409_v12 = vld [vmem:[#allocation8 + $0x20] sm:$0xff]  ;;  %v410_v13 = vld [vmem:[#allocation8 + $0x28] sm:$0xff]  ;;  %v411_v15 = vld [vmem:[#allocation8 + $0x30] sm:$0xff]  ;;  %964 = vmatprep.mubr.msk.f32.mxu0 %vm1426_vm1, %v1427_v26  ;;  %999 = vmatprep.mubr.msk.f32.mxu1 %vm1426_vm1, %v1427_v26  ;;  %s375_s22 = scalar_lea.vmem [#allocation13], %s869_s6  ;;  %s1843_s17 = sld [smem:[#allocation21_spill]] }
  0x8e   : > { %v1044_v14 = vpack.c.bf16 %v410_v13, %v409_v12  ;;  %v412_v16 = vld [vmem:[#allocation8 + $0x38] sm:$0xff]  ;;  %v413_v18 = vld [vmem:[#allocation8 + $0x40] sm:$0xff]  ;;  %v414_v19 = vld [vmem:[#allocation8 + $0x48] sm:$0xff]  ;;  %s735_s24 = sshll.u32 %s375_s22, 4  ;;  %s722_s12 = scalar_lea.sflag [#allocation7], %s1684_s18  ;;  %s1763_s24 = int_to_ptr.vmem [resolvable:$true] %s735_s24 }
  0x8f   : > { %vm382_vm0 = vcmp.lt.s32.totalorder %v1704_v2, 32  ;;  %1039 = vmatpush3.bf16.msra.mxu0 %v1038_v7  ;;  %v1047_v17 = vpack.c.bf16 %v412_v16, %v411_v15  ;;  %v1050_v20 = vpack.c.bf16 %v414_v19, %v413_v18  ;;  %v415_v21 = vld [vmem:[#allocation8 + $0x50] sm:$0xff]  ;;  %v416_v22 = vld [vmem:[#allocation8 + $0x58] sm:$0xff]  ;;  %v417_v24 = vld [vmem:[#allocation8 + $0x60] sm:$0xff]  ;;  %s1327_s27 = scalar_lea.vmem %s1763_s24, 128  ;;  %s1428_s6 = smov [#allocation13]  }
  0x90   : > { %v390_v6 = vsel %vm382_vm0, %v1707_v3, 0.0  ;;  %1040 = vmatprep.subr.bf16.mxu0 %v1425_v1  ;;  %v1053_v23 = vpack.c.bf16 %v416_v22, %v415_v21  ;;  %v418_v25 = vld [vmem:[#allocation8 + $0x68] sm:$0xff]  ;;  %v419_v28 = vld [vmem:[#allocation8 + $0x70] sm:$0xff]  ;;  %v420_v29 = vld [vmem:[#allocation8 + $0x78] sm:$0xff]  ;;  %p1328_p13 = scmp.ne.s32.totalorder %s1763_s24, %s1327_s27  ;;  %s1331_s9 = sshll.u32 %s1428_s6, 4  ;;  %s1332_s9 = int_to_ptr.vmem [resolvable:$false] %s1331_s9 }
  0x91   : > { %391 = vadd.xlane.f32.xlu0 %v390_v6  ;;  %v394_v10 = vmul.f32 %v390_v6, %v390_v6  ;;  %v1056_v27 = vpack.c.bf16 %v418_v25, %v417_v24  ;;  %v1059_v30 = vpack.c.bf16 %v420_v29, %v419_v28  ;;  %v519_v42 = vld [vmem:[#allocation10] sm:$0xff]  ;;  %v520_v43 = vld [vmem:[#allocation10 + $0x8] sm:$0xff]  ;;  %v521_v44 = vld [vmem:[#allocation10 + $0x10] sm:$0xff]  ;;  %s1333_s11 = scalar_lea.vmem %s1332_s9, 256  ;;  %p1334_p5 = scmp.lt.s32.totalorder %s1763_s24, %s1332_s9 }
  0x92   : > { %v1062_v45 = vpack.c.bf16 %v520_v43, %v519_v42  ;;  %v522_v46 = vld [vmem:[#allocation10 + $0x18] sm:$0xff]  ;;  %v874_v49 = vld [vmem:[%s1812_s2] ss:$0 sm:$0xff]  ;;  %v523_v55 = vld [vmem:[#allocation10 + $0x20] sm:$0xff]  ;;  %p1329_p6 = pnand %p1328_p13, %p1629_p10  ;;  %p1335_p7 = scmp.lt.s32.totalorder %s1333_s11, %s1327_s27 }
  0x93   : > { %1042 = vmatpush3.bf16.msra.mxu0 %v1041_v11  ;;  %v1065_v47 = vpack.c.bf16 %v522_v46, %v521_v44  ;;  %v524_v56 = vld [vmem:[#allocation10 + $0x28] sm:$0xff]  ;;  %v525_v58 = vld [vmem:[#allocation10 + $0x30] sm:$0xff]  ;;  %v526_v59 = vld [vmem:[#allocation10 + $0x38] sm:$0xff]  ;;  %s1761_s14 = scalar_lea.hbm %s1843_s17, %s878_s20 }
  0x94   : > { %1043 = vmatprep.subr.bf16.mxu0 %v1425_v1  ;;  %1063 = vmatpush3.bf16.msra.mxu1 %v1062_v45  ;;  %v1068_v57 = vpack.c.bf16 %v524_v56, %v523_v55  ;;  %v1071_v60 = vpack.c.bf16 %v526_v59, %v525_v58  ;;  %v527_v61 = vld [vmem:[#allocation10 + $0x40] sm:$0xff]  ;;  %v528_v62 = vld [vmem:[#allocation10 + $0x48] sm:$0xff]  ;;  %v529_v0 = vld [vmem:[#allocation10 + $0x50] sm:$0xff]  ;;  %p1330_p3 = pneg %p1329_p6  ;;  %p1336_p9 = por %p1335_p7, %p1334_p5 }
  0x95   : > { %395 = vadd.xlane.f32.xlu0 %v394_v10  ;;  %1064 = vmatprep.subr.bf16.mxu1 %v1425_v1  ;;  %v1074_v63 = vpack.c.bf16 %v528_v62, %v527_v61  ;;  %v530_v2 = vld [vmem:[#allocation10 + $0x58] sm:$0xff]  ;;  %v531_v4 = vld [vmem:[#allocation10 + $0x60] sm:$0xff]  ;;  %v532_v5 = vld [vmem:[#allocation10 + $0x68] sm:$0xff] }
  0x96   : > { %v1080_v6 = vpack.c.bf16 %v532_v5, %v531_v4  ;;  %v533_v7 = vld [vmem:[#allocation10 + $0x70] sm:$0xff]  ;;  %v534_v8 = vld [vmem:[#allocation10 + $0x78] sm:$0xff]  ;;  %v618_v10 = vld [vmem:[#allocation11] sm:$0xff]  ;;  %p1337_p0 = pnand %p1336_p9, %p1330_p3 }
  0x97   : > { %1045 = vmatpush3.bf16.msra.mxu0 %v1044_v14  ;;  %v1083_v9 = vpack.c.bf16 %v534_v8, %v533_v7  ;;  %v619_v11 = vld [vmem:[#allocation11 + $0x8] sm:$0xff]  ;;  %v620_v12 = vld [vmem:[#allocation11 + $0x10] sm:$0xff]  ;;  %v621_v14 = vld [vmem:[#allocation11 + $0x18] sm:$0xff] }
  0x98   : > { %1046 = vmatprep.subr.bf16.mxu0 %v1425_v1  ;;  %1066 = vmatpush3.bf16.msra.mxu1 %v1065_v47  ;;  %v1086_v13 = vpack.c.bf16 %v619_v11, %v618_v10  ;;  %v1089_v15 = vpack.c.bf16 %v621_v14, %v620_v12  ;;  %v622_v16 = vld [vmem:[#allocation11 + $0x20] sm:$0xff]  ;;  %v632_v42 = vld [vmem:[#allocation11 + $0x70] sm:$0xff]  ;;  %v633_v43 = vld [vmem:[#allocation11 + $0x78] sm:$0xff] }
  0x99   : > { %1067 = vmatprep.subr.bf16.mxu1 %v1425_v1  ;;  %v1107_v44 = vpack.c.bf16 %v633_v43, %v632_v42  ;;  %v875_v45 = vld [vmem:[%s1814_s4] ss:$0 sm:$0xff] }
  0x9a   : > { %v876_v55 = vld [vmem:[%s1842_s15] ss:$0 sm:$0xff] }
  0x9b   : > { %1048 = vmatpush3.bf16.msra.mxu0 %v1047_v17  ;;  %v623_v17 = vld [vmem:[#allocation11 + $0x28] sm:$0xff] }
  0x9c   : > { %1049 = vmatprep.subr.bf16.mxu0 %v1425_v1  ;;  %1069 = vmatpush3.bf16.msra.mxu1 %v1068_v57  ;;  %v1092_v18 = vpack.c.bf16 %v623_v17, %v622_v16 }
  0x9d   : > { %1070 = vmatprep.subr.bf16.mxu1 %v1425_v1 }
  0x9f   : > { %1051 = vmatpush3.bf16.msra.mxu0 %v1050_v20 }
  0xa0   : > { %1052 = vmatprep.subr.bf16.mxu0 %v1425_v1  ;;  %1072 = vmatpush3.bf16.msra.mxu1 %v1071_v60 }
  0xa1   : > { %1073 = vmatprep.subr.bf16.mxu1 %v1425_v1 }
  0xa3   : > { %1054 = vmatpush3.bf16.msra.mxu0 %v1053_v23 }
  0xa4   : > { %1055 = vmatprep.subr.bf16.mxu0 %v1425_v1  ;;  %1075 = vmatpush3.bf16.msra.mxu1 %v1074_v63 }
  0xa5   : > { %1076 = vmatprep.subr.bf16.mxu1 %v1425_v1 }
  0xa7   : > { %1057 = vmatpush3.bf16.msra.mxu0 %v1056_v27 }
  0xa8   : > { %1058 = vmatprep.subr.bf16.mxu0 %v1425_v1 }
  0xab   : > { %1060 = vmatpush3.bf16.msra.mxu0 %v1059_v30  ;;  %v624_v30 = vld [vmem:[#allocation11 + $0x30] sm:$0xff] }
  0xac   : > { %1085 = vmatprep.subr.bf16.mxu0 %v1425_v1 }
 0x11e   : > { %v392_v31 = vpop.xlane.xlu0 %391 }
 0x11f   : > { %v393_v32 = vmul.f32 0.03125, %v392_v31  ;;  %v625_v31 = vld [vmem:[#allocation11 + $0x38] sm:$0xff] }
 0x121   : > { %v398_v34 = vmul.f32 %v393_v32, %v393_v32  ;;  %v401_v39 = vsub.f32 %v1707_v3, %v393_v32  ;;  %v1095_v32 = vpack.c.bf16 %v625_v31, %v624_v30 }
 0x122   : > { %v396_v33 = vpop.xlane.xlu0 %395 }
 0x123   : > { %v397_v35 = vmul.f32 0.03125, %v396_v33  ;;  %v626_v33 = vld [vmem:[#allocation11 + $0x40] sm:$0xff] }
 0x125   : > { %v399_v36 = vsub.f32 %v397_v35, %v398_v34  ;;  %v627_v34 = vld [vmem:[#allocation11 + $0x48] sm:$0xff] }
 0x126   : > { %v1098_v35 = vpack.c.bf16 %v627_v34, %v626_v33 }
 0x127   : > { %v400_v37 = vmax.f32 %v399_v36, 0.0  ;;  %v628_v36 = vld [vmem:[#allocation11 + $0x50] sm:$0xff] }
 0x129   : > { %v402_v38 = vadd.f32 1e-05, %v400_v37  ;;  %v629_v37 = vld [vmem:[#allocation11 + $0x58] sm:$0xff] }
 0x12b   : > { %1207 = vrsqrt.f32 %v402_v38  ;;  %v1101_v38 = vpack.c.bf16 %v629_v37, %v628_v36 }
 0x135   : > { %v1208_v40 = vpop.eup %1207 }
 0x136   : > { %v404_v41 = vmul.f32 %v1208_v40, %v401_v39  ;;  %v630_v39 = vld [vmem:[#allocation11 + $0x60] sm:$0xff]  ;;  %v631_v40 = vld [vmem:[#allocation11 + $0x68] sm:$0xff] }
 0x138   : > { %965 = vmatmul.mubr.f32.vlgmr.msra.gmra.mrb[0].mxu0 %v404_v41  ;;  %v1104_v41 = vpack.c.bf16 %v631_v40, %v630_v39 }
 0x139   : > { %1034 = vmatprep.mubr.msk.f32.mxu0 %vm1426_vm1, %v1427_v26  ;;  %1087 = vmatpush3.bf16.msra.mxu0 %v1086_v13 }
 0x13a   : > { %1088 = vmatprep.subr.bf16.mxu0 %v1425_v1 }
 0x13d   : > { %1090 = vmatpush3.bf16.msra.mxu0 %v1089_v15 }
 0x13e   : > { %1091 = vmatprep.subr.bf16.mxu0 %v1425_v1 }
 0x141   : > { %1093 = vmatpush3.bf16.msra.mxu0 %v1092_v18 }
 0x142   : > { %1094 = vmatprep.subr.bf16.mxu0 %v1425_v1 }
 0x145   : > { %1096 = vmatpush3.bf16.msra.mxu0 %v1095_v32 }
 0x146   : > { %1097 = vmatprep.subr.bf16.mxu0 %v1425_v1 }
 0x149   : > { %1099 = vmatpush3.bf16.msra.mxu0 %v1098_v35 }
 0x14a   : > { %1100 = vmatprep.subr.bf16.mxu0 %v1425_v1 }
 0x14d   : > { %1102 = vmatpush3.bf16.msra.mxu0 %v1101_v38 }
 0x14e   : > { %1103 = vmatprep.subr.bf16.mxu0 %v1425_v1 }
 0x151   : > { %1105 = vmatpush3.bf16.msra.mxu0 %v1104_v41 }
 0x152   : > { %1106 = vmatprep.subr.bf16.mxu0 %v1425_v1 }
 0x155   : > { %1108 = vmatpush3.bf16.msra.mxu0 %v1107_v44 }
 0x20b   : > { %v487_v48 = vpop.f32.mrb[0].mxu0 }
 0x20c   : > { %v491_v50 = vadd.f32 %v487_v48, %v1707_v3  ;;  %v966_v51 = vpop.f32.mrb[1].mxu0  ;;  %v1077_v3 = vpack.c.bf16 %v530_v2, %v529_v0 }
 0x20e   : > { %v1730_v52 = vadd.f32 %v874_v49, %v491_v50  ;;  %1078 = vmatpush3.bf16.msra.mxu1 %v1077_v3 }
 0x20f   : > { %1079 = vmatprep.subr.bf16.mxu1 %v1425_v1 }
 0x210   : > { %v501_v53 = vsel %vm382_vm0, %v1730_v52, 0.0 }
 0x211   : > { %502 = vadd.xlane.f32.xlu1 %v501_v53  ;;  %v505_v54 = vmul.f32 %v501_v53, %v501_v53 }
 0x212   : > { %1081 = vmatpush3.bf16.msra.mxu1 %v1080_v6 }
 0x213   : > { %1082 = vmatprep.subr.bf16.mxu1 %v1425_v1 }
 0x215   : > { %506 = vadd.xlane.f32.xlu1 %v505_v54 }
 0x216   : > { %1084 = vmatpush3.bf16.msra.mxu1 %v1083_v9 }
 0x29e   : > { %v503_v19 = vpop.xlane.xlu1 %502 }
 0x29f   : > { %v504_v20 = vmul.f32 0.03125, %v503_v19 }
 0x2a1   : > { %v509_v22 = vmul.f32 %v504_v20, %v504_v20  ;;  %v512_v27 = vsub.f32 %v1730_v52, %v504_v20 }
 0x2a2   : > { %v507_v21 = vpop.xlane.xlu1 %506 }
 0x2a3   : > { %v508_v23 = vmul.f32 0.03125, %v507_v21 }
 0x2a5   : > { %v510_v24 = vsub.f32 %v508_v23, %v509_v22 }
 0x2a7   : > { %v511_v25 = vmax.f32 %v510_v24, 0.0 }
 0x2a9   : > { %v513_v26 = vadd.f32 1e-05, %v511_v25 }
 0x2ab   : > { %1209 = vrsqrt.f32 %v513_v26 }
 0x2b5   : > { %v1210_v28 = vpop.eup %1209 }
 0x2b6   : > { %v515_v29 = vmul.f32 %v1210_v28, %v512_v27 }
 0x2b8   : > { %1000 = vmatmul.mubr.f32.vlgmr.msra.gmra.mrb[0].mxu1 %v515_v29 }
 0x38b   : > { %v608_v46 = vpop.f32.mrb[0].mxu1 }
 0x38c   : > { %v609_v47 = vadd.f32 %v875_v45, %v608_v46  ;;  %v1001_v48 = vpop.f32.mrb[1].mxu1 }
 0x38e   : > { %v613_v49 = vmul.f32 0.70710677, %v609_v47  ;;  %v612_v51 = vmul.f32 0.5, %v609_v47 }
 0x390   : > { %1211 = verf.f32 %v613_v49 }
 0x39a   : > { %v1212_v50 = vpop.eup %1211 }
 0x39b   : > { %v615_v53 = vadd.f32 1.0, %v1212_v50 }
 0x39d   : > { %v616_v1 = vmul.f32 %v615_v53, %v612_v51 }
 0x39f   : > { %1035 = vmatmul.mubr.f32.vlgmr.msra.gmra.mrb[2].mxu0 %v616_v1 }
 0x472   : > { %v700_v54 = vpop.f32.mrb[2].mxu0 }
 0x473   : > { %v711_v56 = vadd.f32 %v700_v54, %v1730_v52  ;;  %v1036_v57 = vpop.f32.mrb[3].mxu0 }
 0x475   : > { %v719_v58 = vadd.f32 %v876_v55, %v711_v56 }
 0x477   : > { %720 = vst [vmem:[%s375_s22] sm:$0xff] %v719_v58 }
 0x478   : > { %1340 = shalt.err (!%p1337_p0)
}
 0x479   : > { %s1341_s18 = scalar_lea.hbm %s1761_s14, 128  ;;  %s1345_s19 = scalar_lea.hbm %s1843_s17, 256 }
 0x47a   : > { %p1342_p4 = scmp.ne.s32.totalorder %s1761_s14, %s1341_s18  ;;  %p1346_p1 = scmp.lt.u32.totalorder %s1761_s14, %s1843_s17 }
 0x47b   : > { %p1347_p12 = scmp.lt.u32.totalorder %s1345_s19, %s1341_s18  ;;  %p1349_p13 = scmp.lt.u32.totalorder %s1341_s18, %s1761_s14 }
 0x47c   : > { %p1343_p2 = pnand %p1342_p4, %p1629_p10 }
 0x47d   : > { %p1348_p11 = por %p1347_p12, %p1346_p1 }
 0x47e   : > { %p1344_p8 = pneg %p1343_p2 }
 0x47f   : > { %p1350_p6 = por %p1349_p13, %p1348_p11 }
 0x481   : > { %p1351_p3 = pnand %p1350_p6, %p1344_p8 }
 0x483   : > { %1354 = shalt.err (!%p1351_p3)
}
 0x484   : > { %1123 = dma.vmem_to_hbm [thread:$0]  (%p1629_p10), %s1763_s24, 128, %s1761_s14, %s722_s12  }
 0x485 PF: > { %s1844_s20 = sld [smem:[#allocation18_spill]]  ;;  %s1845_s22 = sld [smem:[#allocation19_spill]] }
 0x486   : > { %p1847_p7 = scmp.ge.s32.totalorder %s1417_s29, 2 }
 0x48b   : > { %s747_s30 = sand.u32 1, %s1844_s20   ;;  %p1846_p5 = scmp.ne.s32.totalorder %s1845_s22, 0 }
 0x48c   : > { %s748_s8 = scalar_lea.sflag [#allocation7], %s747_s30 }
 0x48d   : > { %p1140_p9 = pnand %p1847_p7, %p1846_p5 }
 0x48f   : > { %1392 = dma.done.wait (!%p1140_p9), %s748_s8, 128  }
 0x490   : > { %1394 = vsyncadd (!%p1140_p9), %s748_s8, 4294967168  ;;  %s25_s29 = sadd.s32 1, %s1417_s29   ;;  %s1848_s24 = smov %s1401_s25 }
 0x491   : > { %p22_p0 = scmp.ge.s32.totalorder %s25_s29, 4   ;;  %s1849_s25 = smov %s1405_s26 }
 0x492   : > { %s1850_s26 = smov %s1641_s23  ;;  %s1851_s27 = smov %s1413_s28 }
 0x493   : > { %s1852_s28 = smov %s1854_s16  ;;  %24 = sbr.rel (!%p22_p0) target bundleno = 11 (0xb), region = 118 }
 0x49a   :  { %753 = vsyncpa [#allocation6], 1 }
 0x49b   :  { %755 = vsyncpa [#allocation6 + $0x1], 1 }
 0x49c   :  { %756 = vsyncpa [#allocation9], 1 }
 0x49d   :  { %757 = vsyncpa [#allocation12], 1 }
 0x49e   :  { %758 = vsyncpa [#allocation7], 1 }
 0x49f   :  { %760 = vsyncpa [#allocation7 + $0x1], 1 }

</bundles_post_ra>
